<compile_context>
chip_gen: v6e
topology: v6e:2x2x1
jax: 0.10.0
libtpu: 0.0.40
codegen_flags: <defaults>
</compile_context>

<pallas_src>
import jax
import jax.numpy as jnp
import numpy as np
from jax.experimental import pallas as pl
from jax.experimental.pallas import tpu as pltpu

_LANE = 128      # gate / FC columns are laid out on 128-lane boundaries
_SUBLANE = 8


def _round_up(x, m):
    return (x + m - 1) // m * m


# --------------------------------------------------------------------------- #
# Stage 1 kernel: rows @ W + b  (bf16 inputs, f32 accumulation).
# --------------------------------------------------------------------------- #
def _matmul_bias_kernel(x_ref, w_ref, b_ref, y_ref):
    acc = jnp.dot(x_ref[...], w_ref[...], preferred_element_type=jnp.float32)
    y_ref[...] = (acc + b_ref[...]).astype(y_ref.dtype)


def _matmul_bias(x2d, w, b, *, out_dtype=jnp.float32, block_rows=512):
    """x2d: (R, K) bf16, w: (K, N) bf16, b: (1, N) f32 -> (R, N) out_dtype."""
    R, K = x2d.shape
    N = w.shape[1]
    tr = R if R <= block_rows else block_rows       # block_rows multiple of 8
    grid = (pl.cdiv(R, tr),)
    return pl.pallas_call(
        _matmul_bias_kernel,
        out_shape=jax.ShapeDtypeStruct((R, N), out_dtype),
        grid=grid,
        in_specs=[
            pl.BlockSpec((tr, K), lambda r: (r, 0)),
            pl.BlockSpec((K, N), lambda r: (0, 0)),
            pl.BlockSpec((1, N), lambda r: (0, 0)),
        ],
        out_specs=pl.BlockSpec((tr, N), lambda r: (r, 0)),
        compiler_params=pltpu.CompilerParams(dimension_semantics=("parallel",)),
    )(x2d, w, b)


# --------------------------------------------------------------------------- #
# Stage 2 kernel: LSTM recurrence with fused FC epilogue.
# --------------------------------------------------------------------------- #
def _lstm_fc_kernel(xg_ref, w_hh_ref, w_fc_ref, b_fc_ref, y_ref, h_scr, c_scr):
    """One (batch-block, time-block) tile.

    xg_ref  : (tt, bb, 4Hp) bf16  precomputed x @ W_ih + (b_ih + b_hh)
    w_hh_ref: (Hp, 4Hp)     bf16  hidden -> gates (gate order i,f,g,o, 128-aligned)
    w_fc_ref: (Hp, Fp)      bf16  fused FC weight
    b_fc_ref: (1, Fp)       f32   fused FC bias
    y_ref   : (tt, bb, Fp)  f32   per-step FC output (dense (bb,Fp) tile stores)
    h_scr/c_scr: (bb, Hp)   f32   recurrent state, persists across time blocks
    """
    # NOTE: the time axis MUST be the innermost (fastest-varying) grid axis so
    # this reset runs exactly once per batch block.
    t_blk = pl.program_id(1)
    Hp = h_scr.shape[-1]
    TT = xg_ref.shape[0]

    @pl.when(t_blk == 0)
    def _():
        h_scr[...] = jnp.zeros_like(h_scr)
        c_scr[...] = jnp.zeros_like(c_scr)

    # Hoisted out of the serial loop: weight reads and the FC bias broadcast.
    w_hh = w_hh_ref[...]
    w_fc = w_fc_ref[...]
    b_fc = jnp.broadcast_to(b_fc_ref[...], (y_ref.shape[1], y_ref.shape[2]))

    def step(t, carry):
        h, c = carry                                         # f32 (bb, Hp)
        hb = h.astype(jnp.bfloat16)
        gates = xg_ref[t].astype(jnp.float32) + jnp.dot(
            hb, w_hh, preferred_element_type=jnp.float32)    # (bb, 4Hp) f32
        # sigmoid(x) == 0.5*tanh(0.5*x)+0.5 : one EUP op per activation.
        i_g = 0.5 * jnp.tanh(0.5 * gates[:, 0 * Hp:1 * Hp]) + 0.5
        f_g = 0.5 * jnp.tanh(0.5 * gates[:, 1 * Hp:2 * Hp]) + 0.5
        g_g = jnp.tanh(gates[:, 2 * Hp:3 * Hp])
        o_g = 0.5 * jnp.tanh(0.5 * gates[:, 3 * Hp:4 * Hp]) + 0.5
        c = f_g * c + i_g * g_g
        h = o_g * jnp.tanh(c)
        # Fused FC: not on the h->h dependency chain, overlaps with the next
        # step's recurrent matmul; full (bb, Fp) tile store (lane-dense).
        y_ref[t] = jnp.dot(h.astype(jnp.bfloat16), w_fc,
                           preferred_element_type=jnp.float32) + b_fc
        return (h, c)

    h, c = jax.lax.fori_loop(0, TT, step, (h_scr[...], c_scr[...]), unroll=True)
    h_scr[...] = h
    c_scr[...] = c
    # TODO(synk): if (h_n, c_n) were ever returned (nn.LSTM does, this module
    # discards them), padded time steps would need masking before this store.


# --------------------------------------------------------------------------- #
# Wrapper: input projection -> recurrence (+ fused FC).
# --------------------------------------------------------------------------- #
def spn_forward(x, p, *, time_block=16):
    """x: (B, T, I) float32 (PyTorch batch_first). p: pack_params(...). -> (B, T, F)."""
    w_ih_p, w_hh_p, bias_p, w_fc_p, b_fc = (
        p["w_ih"], p["w_hh"], p["bias"], p["w_fc"], p["b_fc"])
    B, T, I = x.shape
    Hp = w_hh_p.shape[0]
    Fp = w_fc_p.shape[1]
    F = b_fc.shape[1]                       # kept unpadded so F is static here

    # ---- block sizes --------------------------------------------------------
    B_pad = _round_up(B, _SUBLANE)
    if B_pad <= 256:
        bb = B_pad            # no batch split: extra grid steps are pure
    else:                     # overhead on 1-TC chips (v5e/v6e)
        bb = 256              # saturates the MXU M dim on v6e/v7x
        B_pad = _round_up(B_pad, bb)
    tt = min(_round_up(T, _SUBLANE), time_block)
    T_pad = _round_up(T, tt)  # zero-padded tail steps never feed valid outputs

    # ---- stage 1: input projection + folded bias (parallel, lane-dense) -----
    x_tm = jnp.transpose(x, (1, 0, 2)).astype(jnp.bfloat16)            # (T,B,I)
    x_tm = jnp.pad(x_tm, ((0, T_pad - T), (0, B_pad - B), (0, 0)))
    xg = _matmul_bias(x_tm.reshape(T_pad * B_pad, I), w_ih_p, bias_p,
                      out_dtype=jnp.bfloat16)          # bf16: halves HBM stream
    xg = xg.reshape(T_pad, B_pad, 4 * Hp)

    b_fc_p = jnp.pad(b_fc, ((0, 0), (0, Fp - F)))                       # (1,Fp)

    # ---- stage 2: recurrence + fused FC --------------------------------------
    grid = (B_pad // bb, T_pad // tt)       # time axis innermost ("arbitrary")

    cost = pl.CostEstimate(
        flops=(2 * B_pad * T_pad * Hp * 4 * Hp
               + 2 * B_pad * T_pad * Hp * Fp
               + 10 * B_pad * T_pad * Hp),
        transcendentals=5 * B_pad * T_pad * Hp,
        bytes_accessed=(2 * B_pad * T_pad * 4 * Hp
                        + 4 * B_pad * T_pad * Fp
                        + 2 * Hp * 4 * Hp + 2 * Hp * Fp + 4 * Fp),
    )

    # VMEM budget: double-buffered xg / y blocks + weight buffers + state scratch.
    vmem_need = (2 * (bb * tt * 4 * Hp * 2 + bb * tt * Fp * 4
                      + Hp * 4 * Hp * 2 + Hp * Fp * 2 + Fp * 4)
                 + 2 * bb * Hp * 4)
    vmem_limit = int(min(max(2 * vmem_need, 32 * 1024 * 1024), 64 * 1024 * 1024))

    y_tm = pl.pallas_call(
        _lstm_fc_kernel,
        out_shape=jax.ShapeDtypeStruct((T_pad, B_pad, Fp), jnp.float32),
        grid=grid,
        in_specs=[
            pl.BlockSpec((tt, bb, 4 * Hp), lambda b, t: (t, b, 0)),
            pl.BlockSpec((Hp, 4 * Hp), lambda b, t: (0, 0)),
            pl.BlockSpec((Hp, Fp), lambda b, t: (0, 0)),
            pl.BlockSpec((1, Fp), lambda b, t: (0, 0)),
        ],
        out_specs=pl.BlockSpec((tt, bb, Fp), lambda b, t: (t, b, 0)),
        scratch_shapes=[
            pltpu.VMEM((bb, Hp), jnp.float32),   # h state (f32 across steps)
            pltpu.VMEM((bb, Hp), jnp.float32),   # c state
        ],
        compiler_params=pltpu.CompilerParams(
            dimension_semantics=("parallel", "arbitrary"),
            vmem_limit_bytes=vmem_limit),
        cost_estimate=cost,
    )(xg, w_hh_p, w_fc_p, b_fc_p)

    # ---- un-pad and back to batch-first (tiny) --------------------------------
    return jnp.transpose(y_tm[:T, :B, :F], (1, 0, 2))


# --------------------------------------------------------------------------- #
# Parameter init (PyTorch layout), kernel packing, and pure-JAX reference.
# --------------------------------------------------------------------------- #
def init_params(key, input_size, hidden_size, fc_output_size):
    """PyTorch-style uniform(-1/sqrt(H), 1/sqrt(H)) init, PyTorch layouts."""
    ks = jax.random.split(key, 6)
    bound = 1.0 / np.sqrt(hidden_size)
    u = lambda k, shape: jax.random.uniform(
        k, shape, jnp.float32, minval=-bound, maxval=bound)
    w_ih = u(ks[0], (4 * hidden_size, input_size))
    w_hh = u(ks[1], (4 * hidden_size, hidden_size))
    b_ih = u(ks[2], (4 * hidden_size,))
    b_hh = u(ks[3], (4 * hidden_size,))
    w_fc = u(ks[4], (fc_output_size, hidden_size))
    b_fc = u(ks[5], (fc_output_size,))
    return (w_ih, w_hh, b_ih, b_hh, w_fc, b_fc)


def pack_params(raw):
    """Transpose, pad H/F to 128-lane multiples (gate-aligned), cast weights to bf16.

    Zero padding keeps semantics exact: padded gate lanes see bias 0, so padded
    c/h stay identically 0, and padded w_fc rows/cols are 0.
    """
    w_ih, w_hh, b_ih, b_hh, w_fc, b_fc = raw
    H = w_hh.shape[1]
    F = w_fc.shape[0]
    Hp = _round_up(H, _LANE)
    Fp = _round_up(F, _LANE)

    def pad_gate_cols(w_t):                        # (K, 4H) -> (K, 4Hp)
        K = w_t.shape[0]
        out = jnp.zeros((K, 4 * Hp), w_t.dtype)
        for g in range(4):                         # gate order i,f,g,o
            out = out.at[:, g * Hp: g * Hp + H].set(w_t[:, g * H:(g + 1) * H])
        return out

    w_ih_p = pad_gate_cols(w_ih.T).astype(jnp.bfloat16)                  # (I, 4Hp)
    w_hh_p = (jnp.zeros((Hp, 4 * Hp), jnp.float32)
              .at[:H].set(pad_gate_cols(w_hh.T))
              .astype(jnp.bfloat16))                                     # (Hp, 4Hp)
    bias_p = pad_gate_cols((b_ih + b_hh)[None, :]).astype(jnp.float32)   # (1, 4Hp)
    w_fc_p = (jnp.zeros((Hp, Fp), jnp.float32)
              .at[:H, :F].set(w_fc.T)
              .astype(jnp.bfloat16))                                     # (Hp, Fp)
    return {"w_ih": w_ih_p, "w_hh": w_hh_p, "bias": bias_p,
            "w_fc": w_fc_p, "b_fc": b_fc[None, :]}                       # (1, F)


def spn_reference(x, raw):
    """Pure-JAX f32 reference (lax.scan LSTM) matching PyTorch semantics."""
    w_ih, w_hh, b_ih, b_hh, w_fc, b_fc = raw
    H = w_hh.shape[1]
    B = x.shape[0]
    w_ih_t, w_hh_t = w_ih.T, w_hh.T
    bias = (b_ih + b_hh)[None, :]

    def step(carry, x_t):
        h, c = carry
        gates = x_t @ w_ih_t + h @ w_hh_t + bias
        i_g = jax.nn.sigmoid(gates[:, 0 * H:1 * H])
        f_g = jax.nn.sigmoid(gates[:, 1 * H:2 * H])
        g_g = jnp.tanh(gates[:, 2 * H:3 * H])
        o_g = jax.nn.sigmoid(gates[:, 3 * H:4 * H])
        c = f_g * c + i_g * g_g
        h = o_g * jnp.tanh(c)
        return (h, c), h

    h0 = jnp.zeros((B, H), jnp.float32)
    c0 = jnp.zeros((B, H), jnp.float32)
    _, hs = jax.lax.scan(step, (h0, c0), jnp.transpose(x, (1, 0, 2)))
    return jnp.transpose(hs, (1, 0, 2)) @ w_fc.T + b_fc


if __name__ == "__main__":
    # Small shapes consistent with the module: x is (batch, seq, input_size).
    B, T, I, H, F = 2, 8, 4, 32, 8

    key = jax.random.PRNGKey(0)
    k_x, k_p = jax.random.split(key)
    x = jax.random.normal(k_x, (B, T, I), dtype=jnp.float32)
    raw = init_params(k_p, I, H, F)
    packed = pack_params(raw)

    spn_jit = jax.jit(spn_forward)
    y = jax.block_until_ready(spn_jit(x, packed))
    y_ref = jax.block_until_ready(spn_reference(x, raw))

    assert y.shape == (B, T, F), y.shape
    y_np, yr_np = np.asarray(y), np.asarray(y_ref)
    if not np.allclose(y_np, yr_np, atol=2e-2, rtol=2e-2):
        raise AssertionError(
            f"Pallas kernel output mismatch (max abs err {np.max(np.abs(y_np - yr_np)):.4e})")

    print("KERNEL_OK")
</pallas_src>

<mosaic_0001>
module attributes {stable_mosaic.version = 11 : i64} {
  func.func @_matmul_bias_kernel(%arg0: i32, %arg1: memref<64x4xbf16, #tpu.memory_space<vmem>>, %arg2: memref<4x512xbf16, #tpu.memory_space<vmem>>, %arg3: memref<1x512xf32, #tpu.memory_space<vmem>>, %arg4: memref<64x512xbf16, #tpu.memory_space<vmem>>) attributes {dimension_semantics = [#tpu.dimension_semantics<parallel>], iteration_bounds = array<i64: 1>, scalar_prefetch = 0 : i64, scratch_operands = 0 : i64, tpu.core_type = #tpu.core_type<tc>, window_params = [{transform_indices = @transform_0, window_bounds = array<i64: 64, 4>}, {pipeline_mode = #tpu.pipeline_mode<synchronous>, transform_indices = @transform_1, window_bounds = array<i64: 4, 512>}, {pipeline_mode = #tpu.pipeline_mode<synchronous>, transform_indices = @transform_2, window_bounds = array<i64: 1, 512>}, {transform_indices = @transform_3, window_bounds = array<i64: 64, 512>}]} {
    %c0 = arith.constant 0 : index
    %c0_0 = arith.constant 0 : index
    %0 = vector.load %arg1[%c0, %c0_0] : memref<64x4xbf16, #tpu.memory_space<vmem>>, vector<64x4xbf16>
    %c0_1 = arith.constant 0 : index
    %c0_2 = arith.constant 0 : index
    %1 = vector.load %arg2[%c0_1, %c0_2] : memref<4x512xbf16, #tpu.memory_space<vmem>>, vector<4x512xbf16>
    %cst = arith.constant dense<0.000000e+00> : vector<64x512xf32>
    %2 = tpu.matmul %0, %1, %cst {dimension_numbers = #tpu.dot_dimension_numbers<[1], [0], [0], [1], [0, 0, 1, 1], [], []>} : vector<64x4xbf16>, vector<4x512xbf16>, vector<64x512xf32> -> vector<64x512xf32>
    %c0_3 = arith.constant 0 : index
    %c0_4 = arith.constant 0 : index
    %3 = vector.load %arg3[%c0_3, %c0_4] : memref<1x512xf32, #tpu.memory_space<vmem>>, vector<1x512xf32>
    %4 = vector.broadcast %3 : vector<1x512xf32> to vector<64x512xf32>
    %5 = arith.addf %2, %4 : vector<64x512xf32>
    %6 = arith.truncf %5 : vector<64x512xf32> to vector<64x512xbf16>
    %c0_5 = arith.constant 0 : index
    %c0_6 = arith.constant 0 : index
    %7 = vector.load %arg4[%c0_5, %c0_6] : memref<64x512xbf16, #tpu.memory_space<vmem>>, vector<64x512xbf16>
    tpu.vector_store %arg4[%c0_5, %c0_6], %6 {strides = array<i32>} : memref<64x512xbf16, #tpu.memory_space<vmem>>, vector<64x512xbf16>,
    return
  }
  func.func @transform_0(%arg0: i32) -> (i32, i32) {
    %c0_i32 = arith.constant 0 : i32
    %c0_i32_0 = arith.constant 0 : i32
    return %arg0, %c0_i32 : i32, i32
  }
  func.func @transform_1(%arg0: i32) -> (i32, i32) {
    %c0_i32 = arith.constant 0 : i32
    %c0_i32_0 = arith.constant 0 : i32
    %c0_i32_1 = arith.constant 0 : i32
    return %c0_i32, %c0_i32_0 : i32, i32
  }
  func.func @transform_2(%arg0: i32) -> (i32, i32) {
    %c0_i32 = arith.constant 0 : i32
    %c0_i32_0 = arith.constant 0 : i32
    %c0_i32_1 = arith.constant 0 : i32
    return %c0_i32, %c0_i32_0 : i32, i32
  }
  func.func @transform_3(%arg0: i32) -> (i32, i32) {
    %c0_i32 = arith.constant 0 : i32
    %c0_i32_0 = arith.constant 0 : i32
    return %arg0, %c0_i32 : i32, i32
  }
}

module attributes {stable_mosaic.version = 11 : i64} {
  func.func @_lstm_fc_kernel(%arg0: i32, %arg1: i32, %arg2: memref<8x8x512xbf16, #tpu.memory_space<vmem>>, %arg3: memref<128x512xbf16, #tpu.memory_space<vmem>>, %arg4: memref<128x128xbf16, #tpu.memory_space<vmem>>, %arg5: memref<1x128xf32, #tpu.memory_space<vmem>>, %arg6: memref<8x8x128xf32, #tpu.memory_space<vmem>>, %arg7: memref<8x128xf32, #tpu.memory_space<vmem>>, %arg8: memref<8x128xf32, #tpu.memory_space<vmem>>) attributes {dimension_semantics = [#tpu.dimension_semantics<parallel>, #tpu.dimension_semantics<arbitrary>], iteration_bounds = array<i64: 1, 1>, scalar_prefetch = 0 : i64, scratch_operands = 2 : i64, tpu.core_type = #tpu.core_type<tc>, window_params = [{transform_indices = @transform_0, window_bounds = array<i64: 8, 8, 512>}, {pipeline_mode = #tpu.pipeline_mode<synchronous>, transform_indices = @transform_1, window_bounds = array<i64: 128, 512>}, {pipeline_mode = #tpu.pipeline_mode<synchronous>, transform_indices = @transform_2, window_bounds = array<i64: 128, 128>}, {pipeline_mode = #tpu.pipeline_mode<synchronous>, transform_indices = @transform_3, window_bounds = array<i64: 1, 128>}, {transform_indices = @transform_4, window_bounds = array<i64: 8, 8, 128>}]} {
    %c0_i32 = arith.constant 0 : i32
    %0 = arith.cmpi eq, %arg1, %c0_i32 : i32
    %1 = arith.extui %0 : i1 to i32
    %c0_i32_0 = arith.constant 0 : i32
    %2 = arith.cmpi ne, %1, %c0_i32_0 : i32
    scf.if %2 {
      %cst_134 = arith.constant 0.000000e+00 : f32
      %372 = vector.broadcast %cst_134 : f32 to vector<8x128xf32>
      %c0_135 = arith.constant 0 : index
      %c0_136 = arith.constant 0 : index
      %373 = vector.load %arg7[%c0_135, %c0_136] : memref<8x128xf32, #tpu.memory_space<vmem>>, vector<8x128xf32>
      tpu.vector_store %arg7[%c0_135, %c0_136], %372 {strides = array<i32>} : memref<8x128xf32, #tpu.memory_space<vmem>>, vector<8x128xf32>,
      %cst_137 = arith.constant 0.000000e+00 : f32
      %374 = vector.broadcast %cst_137 : f32 to vector<8x128xf32>
      %c0_138 = arith.constant 0 : index
      %c0_139 = arith.constant 0 : index
      %375 = vector.load %arg8[%c0_138, %c0_139] : memref<8x128xf32, #tpu.memory_space<vmem>>, vector<8x128xf32>
      tpu.vector_store %arg8[%c0_138, %c0_139], %374 {strides = array<i32>} : memref<8x128xf32, #tpu.memory_space<vmem>>, vector<8x128xf32>,
    } else {
    }
    %c0 = arith.constant 0 : index
    %c0_1 = arith.constant 0 : index
    %3 = vector.load %arg3[%c0, %c0_1] : memref<128x512xbf16, #tpu.memory_space<vmem>>, vector<128x512xbf16>
    %c0_2 = arith.constant 0 : index
    %c0_3 = arith.constant 0 : index
    %4 = vector.load %arg4[%c0_2, %c0_3] : memref<128x128xbf16, #tpu.memory_space<vmem>>, vector<128x128xbf16>
    %c0_4 = arith.constant 0 : index
    %c0_5 = arith.constant 0 : index
    %5 = vector.load %arg5[%c0_4, %c0_5] : memref<1x128xf32, #tpu.memory_space<vmem>>, vector<1x128xf32>
    %6 = vector.shape_cast %5 : vector<1x128xf32> to vector<1x128xf32>
    %7 = vector.broadcast %6 : vector<1x128xf32> to vector<8x128xf32>
    %c0_6 = arith.constant 0 : index
    %c0_7 = arith.constant 0 : index
    %8 = vector.load %arg7[%c0_6, %c0_7] : memref<8x128xf32, #tpu.memory_space<vmem>>, vector<8x128xf32>
    %c0_8 = arith.constant 0 : index
    %c0_9 = arith.constant 0 : index
    %9 = vector.load %arg8[%c0_8, %c0_9] : memref<8x128xf32, #tpu.memory_space<vmem>>, vector<8x128xf32>
    %c0_i32_10 = arith.constant 0 : i32
    %10 = arith.truncf %8 : vector<8x128xf32> to vector<8x128xbf16>
    %11 = arith.index_cast %c0_i32_10 : i32 to index
    %c0_11 = arith.constant 0 : index
    %c0_12 = arith.constant 0 : index
    %12 = vector.load %arg2[%11, %c0_11, %c0_12] : memref<8x8x512xbf16, #tpu.memory_space<vmem>>, vector<1x8x512xbf16>
    %13 = vector.shape_cast %12 : vector<1x8x512xbf16> to vector<8x512xbf16>
    %14 = arith.extf %13 : vector<8x512xbf16> to vector<8x512xf32>
    %cst = arith.constant dense<0.000000e+00> : vector<8x512xf32>
    %15 = tpu.matmul %10, %3, %cst {dimension_numbers = #tpu.dot_dimension_numbers<[1], [0], [0], [1], [0, 0, 1, 1], [], []>} : vector<8x128xbf16>, vector<128x512xbf16>, vector<8x512xf32> -> vector<8x512xf32>
    %16 = arith.addf %14, %15 : vector<8x512xf32>
    %17 = vector.extract_strided_slice %16 {offsets = [0, 0], sizes = [8, 128], strides = [1, 1]} : vector<8x512xf32> to vector<8x128xf32>
    %cst_13 = arith.constant 5.000000e-01 : f32
    %18 = vector.broadcast %cst_13 : f32 to vector<8x128xf32>
    %19 = arith.mulf %18, %17 : vector<8x128xf32>
    %20 = math.tanh %19 : vector<8x128xf32>
    %cst_14 = arith.constant 5.000000e-01 : f32
    %21 = vector.broadcast %cst_14 : f32 to vector<8x128xf32>
    %22 = arith.mulf %21, %20 : vector<8x128xf32>
    %cst_15 = arith.constant 5.000000e-01 : f32
    %23 = vector.broadcast %cst_15 : f32 to vector<8x128xf32>
    %24 = arith.addf %22, %23 : vector<8x128xf32>
    %25 = vector.extract_strided_slice %16 {offsets = [0, 128], sizes = [8, 128], strides = [1, 1]} : vector<8x512xf32> to vector<8x128xf32>
    %cst_16 = arith.constant 5.000000e-01 : f32
    %26 = vector.broadcast %cst_16 : f32 to vector<8x128xf32>
    %27 = arith.mulf %26, %25 : vector<8x128xf32>
    %28 = math.tanh %27 : vector<8x128xf32>
    %cst_17 = arith.constant 5.000000e-01 : f32
    %29 = vector.broadcast %cst_17 : f32 to vector<8x128xf32>
    %30 = arith.mulf %29, %28 : vector<8x128xf32>
    %cst_18 = arith.constant 5.000000e-01 : f32
    %31 = vector.broadcast %cst_18 : f32 to vector<8x128xf32>
    %32 = arith.addf %30, %31 : vector<8x128xf32>
    %33 = vector.extract_strided_slice %16 {offsets = [0, 256], sizes = [8, 128], strides = [1, 1]} : vector<8x512xf32> to vector<8x128xf32>
    %34 = math.tanh %33 : vector<8x128xf32>
    %35 = vector.extract_strided_slice %16 {offsets = [0, 384], sizes = [8, 128], strides = [1, 1]} : vector<8x512xf32> to vector<8x128xf32>
    %cst_19 = arith.constant 5.000000e-01 : f32
    %36 = vector.broadcast %cst_19 : f32 to vector<8x128xf32>
    %37 = arith.mulf %36, %35 : vector<8x128xf32>
    %38 = math.tanh %37 : vector<8x128xf32>
    %cst_20 = arith.constant 5.000000e-01 : f32
    %39 = vector.broadcast %cst_20 : f32 to vector<8x128xf32>
    %40 = arith.mulf %39, %38 : vector<8x128xf32>
    %cst_21 = arith.constant 5.000000e-01 : f32
    %41 = vector.broadcast %cst_21 : f32 to vector<8x128xf32>
    %42 = arith.addf %40, %41 : vector<8x128xf32>
    %43 = arith.mulf %32, %9 : vector<8x128xf32>
    %44 = arith.mulf %24, %34 : vector<8x128xf32>
    %45 = arith.addf %43, %44 : vector<8x128xf32>
    %46 = math.tanh %45 : vector<8x128xf32>
    %47 = arith.mulf %42, %46 : vector<8x128xf32>
    %48 = arith.truncf %47 : vector<8x128xf32> to vector<8x128xbf16>
    %cst_22 = arith.constant dense<0.000000e+00> : vector<8x128xf32>
    %49 = tpu.matmul %48, %4, %cst_22 {dimension_numbers = #tpu.dot_dimension_numbers<[1], [0], [0], [1], [0, 0, 1, 1], [], []>} : vector<8x128xbf16>, vector<128x128xbf16>, vector<8x128xf32> -> vector<8x128xf32>
    %50 = arith.addf %49, %7 : vector<8x128xf32>
    %51 = arith.index_cast %c0_i32_10 : i32 to index
    %c0_23 = arith.constant 0 : index
    %c0_24 = arith.constant 0 : index
    %52 = vector.load %arg6[%51, %c0_23, %c0_24] : memref<8x8x128xf32, #tpu.memory_space<vmem>>, vector<1x8x128xf32>
    %53 = vector.shape_cast %52 : vector<1x8x128xf32> to vector<8x128xf32>
    %54 = vector.shape_cast %50 : vector<8x128xf32> to vector<1x8x128xf32>
    tpu.vector_store %arg6[%51, %c0_23, %c0_24], %54 {strides = array<i32>} : memref<8x8x128xf32, #tpu.memory_space<vmem>>, vector<1x8x128xf32>,
    %c1_i32 = arith.constant 1 : i32
    %55 = arith.truncf %47 : vector<8x128xf32> to vector<8x128xbf16>
    %56 = arith.index_cast %c1_i32 : i32 to index
    %c0_25 = arith.constant 0 : index
    %c0_26 = arith.constant 0 : index
    %57 = vector.load %arg2[%56, %c0_25, %c0_26] : memref<8x8x512xbf16, #tpu.memory_space<vmem>>, vector<1x8x512xbf16>
    %58 = vector.shape_cast %57 : vector<1x8x512xbf16> to vector<8x512xbf16>
    %59 = arith.extf %58 : vector<8x512xbf16> to vector<8x512xf32>
    %cst_27 = arith.constant dense<0.000000e+00> : vector<8x512xf32>
    %60 = tpu.matmul %55, %3, %cst_27 {dimension_numbers = #tpu.dot_dimension_numbers<[1], [0], [0], [1], [0, 0, 1, 1], [], []>} : vector<8x128xbf16>, vector<128x512xbf16>, vector<8x512xf32> -> vector<8x512xf32>
    %61 = arith.addf %59, %60 : vector<8x512xf32>
    %62 = vector.extract_strided_slice %61 {offsets = [0, 0], sizes = [8, 128], strides = [1, 1]} : vector<8x512xf32> to vector<8x128xf32>
    %cst_28 = arith.constant 5.000000e-01 : f32
    %63 = vector.broadcast %cst_28 : f32 to vector<8x128xf32>
    %64 = arith.mulf %63, %62 : vector<8x128xf32>
    %65 = math.tanh %64 : vector<8x128xf32>
    %cst_29 = arith.constant 5.000000e-01 : f32
    %66 = vector.broadcast %cst_29 : f32 to vector<8x128xf32>
    %67 = arith.mulf %66, %65 : vector<8x128xf32>
    %cst_30 = arith.constant 5.000000e-01 : f32
    %68 = vector.broadcast %cst_30 : f32 to vector<8x128xf32>
    %69 = arith.addf %67, %68 : vector<8x128xf32>
    %70 = vector.extract_strided_slice %61 {offsets = [0, 128], sizes = [8, 128], strides = [1, 1]} : vector<8x512xf32> to vector<8x128xf32>
    %cst_31 = arith.constant 5.000000e-01 : f32
    %71 = vector.broadcast %cst_31 : f32 to vector<8x128xf32>
    %72 = arith.mulf %71, %70 : vector<8x128xf32>
    %73 = math.tanh %72 : vector<8x128xf32>
    %cst_32 = arith.constant 5.000000e-01 : f32
    %74 = vector.broadcast %cst_32 : f32 to vector<8x128xf32>
    %75 = arith.mulf %74, %73 : vector<8x128xf32>
    %cst_33 = arith.constant 5.000000e-01 : f32
    %76 = vector.broadcast %cst_33 : f32 to vector<8x128xf32>
    %77 = arith.addf %75, %76 : vector<8x128xf32>
    %78 = vector.extract_strided_slice %61 {offsets = [0, 256], sizes = [8, 128], strides = [1, 1]} : vector<8x512xf32> to vector<8x128xf32>
    %79 = math.tanh %78 : vector<8x128xf32>
    %80 = vector.extract_strided_slice %61 {offsets = [0, 384], sizes = [8, 128], strides = [1, 1]} : vector<8x512xf32> to vector<8x128xf32>
    %cst_34 = arith.constant 5.000000e-01 : f32
    %81 = vector.broadcast %cst_34 : f32 to vector<8x128xf32>
    %82 = arith.mulf %81, %80 : vector<8x128xf32>
    %83 = math.tanh %82 : vector<8x128xf32>
    %cst_35 = arith.constant 5.000000e-01 : f32
    %84 = vector.broadcast %cst_35 : f32 to vector<8x128xf32>
    %85 = arith.mulf %84, %83 : vector<8x128xf32>
    %cst_36 = arith.constant 5.000000e-01 : f32
    %86 = vector.broadcast %cst_36 : f32 to vector<8x128xf32>
    %87 = arith.addf %85, %86 : vector<8x128xf32>
    %88 = arith.mulf %77, %45 : vector<8x128xf32>
    %89 = arith.mulf %69, %79 : vector<8x128xf32>
    %90 = arith.addf %88, %89 : vector<8x128xf32>
    %91 = math.tanh %90 : vector<8x128xf32>
    %92 = arith.mulf %87, %91 : vector<8x128xf32>
    %93 = arith.truncf %92 : vector<8x128xf32> to vector<8x128xbf16>
    %cst_37 = arith.constant dense<0.000000e+00> : vector<8x128xf32>
    %94 = tpu.matmul %93, %4, %cst_37 {dimension_numbers = #tpu.dot_dimension_numbers<[1], [0], [0], [1], [0, 0, 1, 1], [], []>} : vector<8x128xbf16>, vector<128x128xbf16>, vector<8x128xf32> -> vector<8x128xf32>
    %95 = arith.addf %94, %7 : vector<8x128xf32>
    %96 = arith.index_cast %c1_i32 : i32 to index
    %c0_38 = arith.constant 0 : index
    %c0_39 = arith.constant 0 : index
    %97 = vector.load %arg6[%96, %c0_38, %c0_39] : memref<8x8x128xf32, #tpu.memory_space<vmem>>, vector<1x8x128xf32>
    %98 = vector.shape_cast %97 : vector<1x8x128xf32> to vector<8x128xf32>
    %99 = vector.shape_cast %95 : vector<8x128xf32> to vector<1x8x128xf32>
    tpu.vector_store %arg6[%96, %c0_38, %c0_39], %99 {strides = array<i32>} : memref<8x8x128xf32, #tpu.memory_space<vmem>>, vector<1x8x128xf32>,
    %c2_i32 = arith.constant 2 : i32
    %100 = arith.truncf %92 : vector<8x128xf32> to vector<8x128xbf16>
    %101 = arith.index_cast %c2_i32 : i32 to index
    %c0_40 = arith.constant 0 : index
    %c0_41 = arith.constant 0 : index
    %102 = vector.load %arg2[%101, %c0_40, %c0_41] : memref<8x8x512xbf16, #tpu.memory_space<vmem>>, vector<1x8x512xbf16>
    %103 = vector.shape_cast %102 : vector<1x8x512xbf16> to vector<8x512xbf16>
    %104 = arith.extf %103 : vector<8x512xbf16> to vector<8x512xf32>
    %cst_42 = arith.constant dense<0.000000e+00> : vector<8x512xf32>
    %105 = tpu.matmul %100, %3, %cst_42 {dimension_numbers = #tpu.dot_dimension_numbers<[1], [0], [0], [1], [0, 0, 1, 1], [], []>} : vector<8x128xbf16>, vector<128x512xbf16>, vector<8x512xf32> -> vector<8x512xf32>
    %106 = arith.addf %104, %105 : vector<8x512xf32>
    %107 = vector.extract_strided_slice %106 {offsets = [0, 0], sizes = [8, 128], strides = [1, 1]} : vector<8x512xf32> to vector<8x128xf32>
    %cst_43 = arith.constant 5.000000e-01 : f32
    %108 = vector.broadcast %cst_43 : f32 to vector<8x128xf32>
    %109 = arith.mulf %108, %107 : vector<8x128xf32>
    %110 = math.tanh %109 : vector<8x128xf32>
    %cst_44 = arith.constant 5.000000e-01 : f32
    %111 = vector.broadcast %cst_44 : f32 to vector<8x128xf32>
    %112 = arith.mulf %111, %110 : vector<8x128xf32>
    %cst_45 = arith.constant 5.000000e-01 : f32
    %113 = vector.broadcast %cst_45 : f32 to vector<8x128xf32>
    %114 = arith.addf %112, %113 : vector<8x128xf32>
    %115 = vector.extract_strided_slice %106 {offsets = [0, 128], sizes = [8, 128], strides = [1, 1]} : vector<8x512xf32> to vector<8x128xf32>
    %cst_46 = arith.constant 5.000000e-01 : f32
    %116 = vector.broadcast %cst_46 : f32 to vector<8x128xf32>
    %117 = arith.mulf %116, %115 : vector<8x128xf32>
    %118 = math.tanh %117 : vector<8x128xf32>
    %cst_47 = arith.constant 5.000000e-01 : f32
    %119 = vector.broadcast %cst_47 : f32 to vector<8x128xf32>
    %120 = arith.mulf %119, %118 : vector<8x128xf32>
    %cst_48 = arith.constant 5.000000e-01 : f32
    %121 = vector.broadcast %cst_48 : f32 to vector<8x128xf32>
    %122 = arith.addf %120, %121 : vector<8x128xf32>
    %123 = vector.extract_strided_slice %106 {offsets = [0, 256], sizes = [8, 128], strides = [1, 1]} : vector<8x512xf32> to vector<8x128xf32>
    %124 = math.tanh %123 : vector<8x128xf32>
    %125 = vector.extract_strided_slice %106 {offsets = [0, 384], sizes = [8, 128], strides = [1, 1]} : vector<8x512xf32> to vector<8x128xf32>
    %cst_49 = arith.constant 5.000000e-01 : f32
    %126 = vector.broadcast %cst_49 : f32 to vector<8x128xf32>
    %127 = arith.mulf %126, %125 : vector<8x128xf32>
    %128 = math.tanh %127 : vector<8x128xf32>
    %cst_50 = arith.constant 5.000000e-01 : f32
    %129 = vector.broadcast %cst_50 : f32 to vector<8x128xf32>
    %130 = arith.mulf %129, %128 : vector<8x128xf32>
    %cst_51 = arith.constant 5.000000e-01 : f32
    %131 = vector.broadcast %cst_51 : f32 to vector<8x128xf32>
    %132 = arith.addf %130, %131 : vector<8x128xf32>
    %133 = arith.mulf %122, %90 : vector<8x128xf32>
    %134 = arith.mulf %114, %124 : vector<8x128xf32>
    %135 = arith.addf %133, %134 : vector<8x128xf32>
    %136 = math.tanh %135 : vector<8x128xf32>
    %137 = arith.mulf %132, %136 : vector<8x128xf32>
    %138 = arith.truncf %137 : vector<8x128xf32> to vector<8x128xbf16>
    %cst_52 = arith.constant dense<0.000000e+00> : vector<8x128xf32>
    %139 = tpu.matmul %138, %4, %cst_52 {dimension_numbers = #tpu.dot_dimension_numbers<[1], [0], [0], [1], [0, 0, 1, 1], [], []>} : vector<8x128xbf16>, vector<128x128xbf16>, vector<8x128xf32> -> vector<8x128xf32>
    %140 = arith.addf %139, %7 : vector<8x128xf32>
    %141 = arith.index_cast %c2_i32 : i32 to index
    %c0_53 = arith.constant 0 : index
    %c0_54 = arith.constant 0 : index
    %142 = vector.load %arg6[%141, %c0_53, %c0_54] : memref<8x8x128xf32, #tpu.memory_space<vmem>>, vector<1x8x128xf32>
    %143 = vector.shape_cast %142 : vector<1x8x128xf32> to vector<8x128xf32>
    %144 = vector.shape_cast %140 : vector<8x128xf32> to vector<1x8x128xf32>
    tpu.vector_store %arg6[%141, %c0_53, %c0_54], %144 {strides = array<i32>} : memref<8x8x128xf32, #tpu.memory_space<vmem>>, vector<1x8x128xf32>,
    %c3_i32 = arith.constant 3 : i32
    %145 = arith.truncf %137 : vector<8x128xf32> to vector<8x128xbf16>
    %146 = arith.index_cast %c3_i32 : i32 to index
    %c0_55 = arith.constant 0 : index
    %c0_56 = arith.constant 0 : index
    %147 = vector.load %arg2[%146, %c0_55, %c0_56] : memref<8x8x512xbf16, #tpu.memory_space<vmem>>, vector<1x8x512xbf16>
    %148 = vector.shape_cast %147 : vector<1x8x512xbf16> to vector<8x512xbf16>
    %149 = arith.extf %148 : vector<8x512xbf16> to vector<8x512xf32>
    %cst_57 = arith.constant dense<0.000000e+00> : vector<8x512xf32>
    %150 = tpu.matmul %145, %3, %cst_57 {dimension_numbers = #tpu.dot_dimension_numbers<[1], [0], [0], [1], [0, 0, 1, 1], [], []>} : vector<8x128xbf16>, vector<128x512xbf16>, vector<8x512xf32> -> vector<8x512xf32>
    %151 = arith.addf %149, %150 : vector<8x512xf32>
    %152 = vector.extract_strided_slice %151 {offsets = [0, 0], sizes = [8, 128], strides = [1, 1]} : vector<8x512xf32> to vector<8x128xf32>
    %cst_58 = arith.constant 5.000000e-01 : f32
    %153 = vector.broadcast %cst_58 : f32 to vector<8x128xf32>
    %154 = arith.mulf %153, %152 : vector<8x128xf32>
    %155 = math.tanh %154 : vector<8x128xf32>
    %cst_59 = arith.constant 5.000000e-01 : f32
    %156 = vector.broadcast %cst_59 : f32 to vector<8x128xf32>
    %157 = arith.mulf %156, %155 : vector<8x128xf32>
    %cst_60 = arith.constant 5.000000e-01 : f32
    %158 = vector.broadcast %cst_60 : f32 to vector<8x128xf32>
    %159 = arith.addf %157, %158 : vector<8x128xf32>
    %160 = vector.extract_strided_slice %151 {offsets = [0, 128], sizes = [8, 128], strides = [1, 1]} : vector<8x512xf32> to vector<8x128xf32>
    %cst_61 = arith.constant 5.000000e-01 : f32
    %161 = vector.broadcast %cst_61 : f32 to vector<8x128xf32>
    %162 = arith.mulf %161, %160 : vector<8x128xf32>
    %163 = math.tanh %162 : vector<8x128xf32>
    %cst_62 = arith.constant 5.000000e-01 : f32
    %164 = vector.broadcast %cst_62 : f32 to vector<8x128xf32>
    %165 = arith.mulf %164, %163 : vector<8x128xf32>
    %cst_63 = arith.constant 5.000000e-01 : f32
    %166 = vector.broadcast %cst_63 : f32 to vector<8x128xf32>
    %167 = arith.addf %165, %166 : vector<8x128xf32>
    %168 = vector.extract_strided_slice %151 {offsets = [0, 256], sizes = [8, 128], strides = [1, 1]} : vector<8x512xf32> to vector<8x128xf32>
    %169 = math.tanh %168 : vector<8x128xf32>
    %170 = vector.extract_strided_slice %151 {offsets = [0, 384], sizes = [8, 128], strides = [1, 1]} : vector<8x512xf32> to vector<8x128xf32>
    %cst_64 = arith.constant 5.000000e-01 : f32
    %171 = vector.broadcast %cst_64 : f32 to vector<8x128xf32>
    %172 = arith.mulf %171, %170 : vector<8x128xf32>
    %173 = math.tanh %172 : vector<8x128xf32>
    %cst_65 = arith.constant 5.000000e-01 : f32
    %174 = vector.broadcast %cst_65 : f32 to vector<8x128xf32>
    %175 = arith.mulf %174, %173 : vector<8x128xf32>
    %cst_66 = arith.constant 5.000000e-01 : f32
    %176 = vector.broadcast %cst_66 : f32 to vector<8x128xf32>
    %177 = arith.addf %175, %176 : vector<8x128xf32>
    %178 = arith.mulf %167, %135 : vector<8x128xf32>
    %179 = arith.mulf %159, %169 : vector<8x128xf32>
    %180 = arith.addf %178, %179 : vector<8x128xf32>
    %181 = math.tanh %180 : vector<8x128xf32>
    %182 = arith.mulf %177, %181 : vector<8x128xf32>
    %183 = arith.truncf %182 : vector<8x128xf32> to vector<8x128xbf16>
    %cst_67 = arith.constant dense<0.000000e+00> : vector<8x128xf32>
    %184 = tpu.matmul %183, %4, %cst_67 {dimension_numbers = #tpu.dot_dimension_numbers<[1], [0], [0], [1], [0, 0, 1, 1], [], []>} : vector<8x128xbf16>, vector<128x128xbf16>, vector<8x128xf32> -> vector<8x128xf32>
    %185 = arith.addf %184, %7 : vector<8x128xf32>
    %186 = arith.index_cast %c3_i32 : i32 to index
    %c0_68 = arith.constant 0 : index
    %c0_69 = arith.constant 0 : index
    %187 = vector.load %arg6[%186, %c0_68, %c0_69] : memref<8x8x128xf32, #tpu.memory_space<vmem>>, vector<1x8x128xf32>
    %188 = vector.shape_cast %187 : vector<1x8x128xf32> to vector<8x128xf32>
    %189 = vector.shape_cast %185 : vector<8x128xf32> to vector<1x8x128xf32>
    tpu.vector_store %arg6[%186, %c0_68, %c0_69], %189 {strides = array<i32>} : memref<8x8x128xf32, #tpu.memory_space<vmem>>, vector<1x8x128xf32>,
    %c4_i32 = arith.constant 4 : i32
    %190 = arith.truncf %182 : vector<8x128xf32> to vector<8x128xbf16>
    %191 = arith.index_cast %c4_i32 : i32 to index
    %c0_70 = arith.constant 0 : index
    %c0_71 = arith.constant 0 : index
    %192 = vector.load %arg2[%191, %c0_70, %c0_71] : memref<8x8x512xbf16, #tpu.memory_space<vmem>>, vector<1x8x512xbf16>
    %193 = vector.shape_cast %192 : vector<1x8x512xbf16> to vector<8x512xbf16>
    %194 = arith.extf %193 : vector<8x512xbf16> to vector<8x512xf32>
    %cst_72 = arith.constant dense<0.000000e+00> : vector<8x512xf32>
    %195 = tpu.matmul %190, %3, %cst_72 {dimension_numbers = #tpu.dot_dimension_numbers<[1], [0], [0], [1], [0, 0, 1, 1], [], []>} : vector<8x128xbf16>, vector<128x512xbf16>, vector<8x512xf32> -> vector<8x512xf32>
    %196 = arith.addf %194, %195 : vector<8x512xf32>
    %197 = vector.extract_strided_slice %196 {offsets = [0, 0], sizes = [8, 128], strides = [1, 1]} : vector<8x512xf32> to vector<8x128xf32>
    %cst_73 = arith.constant 5.000000e-01 : f32
    %198 = vector.broadcast %cst_73 : f32 to vector<8x128xf32>
    %199 = arith.mulf %198, %197 : vector<8x128xf32>
    %200 = math.tanh %199 : vector<8x128xf32>
    %cst_74 = arith.constant 5.000000e-01 : f32
    %201 = vector.broadcast %cst_74 : f32 to vector<8x128xf32>
    %202 = arith.mulf %201, %200 : vector<8x128xf32>
    %cst_75 = arith.constant 5.000000e-01 : f32
    %203 = vector.broadcast %cst_75 : f32 to vector<8x128xf32>
    %204 = arith.addf %202, %203 : vector<8x128xf32>
    %205 = vector.extract_strided_slice %196 {offsets = [0, 128], sizes = [8, 128], strides = [1, 1]} : vector<8x512xf32> to vector<8x128xf32>
    %cst_76 = arith.constant 5.000000e-01 : f32
    %206 = vector.broadcast %cst_76 : f32 to vector<8x128xf32>
    %207 = arith.mulf %206, %205 : vector<8x128xf32>
    %208 = math.tanh %207 : vector<8x128xf32>
    %cst_77 = arith.constant 5.000000e-01 : f32
    %209 = vector.broadcast %cst_77 : f32 to vector<8x128xf32>
    %210 = arith.mulf %209, %208 : vector<8x128xf32>
    %cst_78 = arith.constant 5.000000e-01 : f32
    %211 = vector.broadcast %cst_78 : f32 to vector<8x128xf32>
    %212 = arith.addf %210, %211 : vector<8x128xf32>
    %213 = vector.extract_strided_slice %196 {offsets = [0, 256], sizes = [8, 128], strides = [1, 1]} : vector<8x512xf32> to vector<8x128xf32>
    %214 = math.tanh %213 : vector<8x128xf32>
    %215 = vector.extract_strided_slice %196 {offsets = [0, 384], sizes = [8, 128], strides = [1, 1]} : vector<8x512xf32> to vector<8x128xf32>
    %cst_79 = arith.constant 5.000000e-01 : f32
    %216 = vector.broadcast %cst_79 : f32 to vector<8x128xf32>
    %217 = arith.mulf %216, %215 : vector<8x128xf32>
    %218 = math.tanh %217 : vector<8x128xf32>
    %cst_80 = arith.constant 5.000000e-01 : f32
    %219 = vector.broadcast %cst_80 : f32 to vector<8x128xf32>
    %220 = arith.mulf %219, %218 : vector<8x128xf32>
    %cst_81 = arith.constant 5.000000e-01 : f32
    %221 = vector.broadcast %cst_81 : f32 to vector<8x128xf32>
    %222 = arith.addf %220, %221 : vector<8x128xf32>
    %223 = arith.mulf %212, %180 : vector<8x128xf32>
    %224 = arith.mulf %204, %214 : vector<8x128xf32>
    %225 = arith.addf %223, %224 : vector<8x128xf32>
    %226 = math.tanh %225 : vector<8x128xf32>
    %227 = arith.mulf %222, %226 : vector<8x128xf32>
    %228 = arith.truncf %227 : vector<8x128xf32> to vector<8x128xbf16>
    %cst_82 = arith.constant dense<0.000000e+00> : vector<8x128xf32>
    %229 = tpu.matmul %228, %4, %cst_82 {dimension_numbers = #tpu.dot_dimension_numbers<[1], [0], [0], [1], [0, 0, 1, 1], [], []>} : vector<8x128xbf16>, vector<128x128xbf16>, vector<8x128xf32> -> vector<8x128xf32>
    %230 = arith.addf %229, %7 : vector<8x128xf32>
    %231 = arith.index_cast %c4_i32 : i32 to index
    %c0_83 = arith.constant 0 : index
    %c0_84 = arith.constant 0 : index
    %232 = vector.load %arg6[%231, %c0_83, %c0_84] : memref<8x8x128xf32, #tpu.memory_space<vmem>>, vector<1x8x128xf32>
    %233 = vector.shape_cast %232 : vector<1x8x128xf32> to vector<8x128xf32>
    %234 = vector.shape_cast %230 : vector<8x128xf32> to vector<1x8x128xf32>
    tpu.vector_store %arg6[%231, %c0_83, %c0_84], %234 {strides = array<i32>} : memref<8x8x128xf32, #tpu.memory_space<vmem>>, vector<1x8x128xf32>,
    %c5_i32 = arith.constant 5 : i32
    %235 = arith.truncf %227 : vector<8x128xf32> to vector<8x128xbf16>
    %236 = arith.index_cast %c5_i32 : i32 to index
    %c0_85 = arith.constant 0 : index
    %c0_86 = arith.constant 0 : index
    %237 = vector.load %arg2[%236, %c0_85, %c0_86] : memref<8x8x512xbf16, #tpu.memory_space<vmem>>, vector<1x8x512xbf16>
    %238 = vector.shape_cast %237 : vector<1x8x512xbf16> to vector<8x512xbf16>
    %239 = arith.extf %238 : vector<8x512xbf16> to vector<8x512xf32>
    %cst_87 = arith.constant dense<0.000000e+00> : vector<8x512xf32>
    %240 = tpu.matmul %235, %3, %cst_87 {dimension_numbers = #tpu.dot_dimension_numbers<[1], [0], [0], [1], [0, 0, 1, 1], [], []>} : vector<8x128xbf16>, vector<128x512xbf16>, vector<8x512xf32> -> vector<8x512xf32>
    %241 = arith.addf %239, %240 : vector<8x512xf32>
    %242 = vector.extract_strided_slice %241 {offsets = [0, 0], sizes = [8, 128], strides = [1, 1]} : vector<8x512xf32> to vector<8x128xf32>
    %cst_88 = arith.constant 5.000000e-01 : f32
    %243 = vector.broadcast %cst_88 : f32 to vector<8x128xf32>
    %244 = arith.mulf %243, %242 : vector<8x128xf32>
    %245 = math.tanh %244 : vector<8x128xf32>
    %cst_89 = arith.constant 5.000000e-01 : f32
    %246 = vector.broadcast %cst_89 : f32 to vector<8x128xf32>
    %247 = arith.mulf %246, %245 : vector<8x128xf32>
    %cst_90 = arith.constant 5.000000e-01 : f32
    %248 = vector.broadcast %cst_90 : f32 to vector<8x128xf32>
    %249 = arith.addf %247, %248 : vector<8x128xf32>
    %250 = vector.extract_strided_slice %241 {offsets = [0, 128], sizes = [8, 128], strides = [1, 1]} : vector<8x512xf32> to vector<8x128xf32>
    %cst_91 = arith.constant 5.000000e-01 : f32
    %251 = vector.broadcast %cst_91 : f32 to vector<8x128xf32>
    %252 = arith.mulf %251, %250 : vector<8x128xf32>
    %253 = math.tanh %252 : vector<8x128xf32>
    %cst_92 = arith.constant 5.000000e-01 : f32
    %254 = vector.broadcast %cst_92 : f32 to vector<8x128xf32>
    %255 = arith.mulf %254, %253 : vector<8x128xf32>
    %cst_93 = arith.constant 5.000000e-01 : f32
    %256 = vector.broadcast %cst_93 : f32 to vector<8x128xf32>
    %257 = arith.addf %255, %256 : vector<8x128xf32>
    %258 = vector.extract_strided_slice %241 {offsets = [0, 256], sizes = [8, 128], strides = [1, 1]} : vector<8x512xf32> to vector<8x128xf32>
    %259 = math.tanh %258 : vector<8x128xf32>
    %260 = vector.extract_strided_slice %241 {offsets = [0, 384], sizes = [8, 128], strides = [1, 1]} : vector<8x512xf32> to vector<8x128xf32>
    %cst_94 = arith.constant 5.000000e-01 : f32
    %261 = vector.broadcast %cst_94 : f32 to vector<8x128xf32>
    %262 = arith.mulf %261, %260 : vector<8x128xf32>
    %263 = math.tanh %262 : vector<8x128xf32>
    %cst_95 = arith.constant 5.000000e-01 : f32
    %264 = vector.broadcast %cst_95 : f32 to vector<8x128xf32>
    %265 = arith.mulf %264, %263 : vector<8x128xf32>
    %cst_96 = arith.constant 5.000000e-01 : f32
    %266 = vector.broadcast %cst_96 : f32 to vector<8x128xf32>
    %267 = arith.addf %265, %266 : vector<8x128xf32>
    %268 = arith.mulf %257, %225 : vector<8x128xf32>
    %269 = arith.mulf %249, %259 : vector<8x128xf32>
    %270 = arith.addf %268, %269 : vector<8x128xf32>
    %271 = math.tanh %270 : vector<8x128xf32>
    %272 = arith.mulf %267, %271 : vector<8x128xf32>
    %273 = arith.truncf %272 : vector<8x128xf32> to vector<8x128xbf16>
    %cst_97 = arith.constant dense<0.000000e+00> : vector<8x128xf32>
    %274 = tpu.matmul %273, %4, %cst_97 {dimension_numbers = #tpu.dot_dimension_numbers<[1], [0], [0], [1], [0, 0, 1, 1], [], []>} : vector<8x128xbf16>, vector<128x128xbf16>, vector<8x128xf32> -> vector<8x128xf32>
    %275 = arith.addf %274, %7 : vector<8x128xf32>
    %276 = arith.index_cast %c5_i32 : i32 to index
    %c0_98 = arith.constant 0 : index
    %c0_99 = arith.constant 0 : index
    %277 = vector.load %arg6[%276, %c0_98, %c0_99] : memref<8x8x128xf32, #tpu.memory_space<vmem>>, vector<1x8x128xf32>
    %278 = vector.shape_cast %277 : vector<1x8x128xf32> to vector<8x128xf32>
    %279 = vector.shape_cast %275 : vector<8x128xf32> to vector<1x8x128xf32>
    tpu.vector_store %arg6[%276, %c0_98, %c0_99], %279 {strides = array<i32>} : memref<8x8x128xf32, #tpu.memory_space<vmem>>, vector<1x8x128xf32>,
    %c6_i32 = arith.constant 6 : i32
    %280 = arith.truncf %272 : vector<8x128xf32> to vector<8x128xbf16>
    %281 = arith.index_cast %c6_i32 : i32 to index
    %c0_100 = arith.constant 0 : index
    %c0_101 = arith.constant 0 : index
    %282 = vector.load %arg2[%281, %c0_100, %c0_101] : memref<8x8x512xbf16, #tpu.memory_space<vmem>>, vector<1x8x512xbf16>
    %283 = vector.shape_cast %282 : vector<1x8x512xbf16> to vector<8x512xbf16>
    %284 = arith.extf %283 : vector<8x512xbf16> to vector<8x512xf32>
    %cst_102 = arith.constant dense<0.000000e+00> : vector<8x512xf32>
    %285 = tpu.matmul %280, %3, %cst_102 {dimension_numbers = #tpu.dot_dimension_numbers<[1], [0], [0], [1], [0, 0, 1, 1], [], []>} : vector<8x128xbf16>, vector<128x512xbf16>, vector<8x512xf32> -> vector<8x512xf32>
    %286 = arith.addf %284, %285 : vector<8x512xf32>
    %287 = vector.extract_strided_slice %286 {offsets = [0, 0], sizes = [8, 128], strides = [1, 1]} : vector<8x512xf32> to vector<8x128xf32>
    %cst_103 = arith.constant 5.000000e-01 : f32
    %288 = vector.broadcast %cst_103 : f32 to vector<8x128xf32>
    %289 = arith.mulf %288, %287 : vector<8x128xf32>
    %290 = math.tanh %289 : vector<8x128xf32>
    %cst_104 = arith.constant 5.000000e-01 : f32
    %291 = vector.broadcast %cst_104 : f32 to vector<8x128xf32>
    %292 = arith.mulf %291, %290 : vector<8x128xf32>
    %cst_105 = arith.constant 5.000000e-01 : f32
    %293 = vector.broadcast %cst_105 : f32 to vector<8x128xf32>
    %294 = arith.addf %292, %293 : vector<8x128xf32>
    %295 = vector.extract_strided_slice %286 {offsets = [0, 128], sizes = [8, 128], strides = [1, 1]} : vector<8x512xf32> to vector<8x128xf32>
    %cst_106 = arith.constant 5.000000e-01 : f32
    %296 = vector.broadcast %cst_106 : f32 to vector<8x128xf32>
    %297 = arith.mulf %296, %295 : vector<8x128xf32>
    %298 = math.tanh %297 : vector<8x128xf32>
    %cst_107 = arith.constant 5.000000e-01 : f32
    %299 = vector.broadcast %cst_107 : f32 to vector<8x128xf32>
    %300 = arith.mulf %299, %298 : vector<8x128xf32>
    %cst_108 = arith.constant 5.000000e-01 : f32
    %301 = vector.broadcast %cst_108 : f32 to vector<8x128xf32>
    %302 = arith.addf %300, %301 : vector<8x128xf32>
    %303 = vector.extract_strided_slice %286 {offsets = [0, 256], sizes = [8, 128], strides = [1, 1]} : vector<8x512xf32> to vector<8x128xf32>
    %304 = math.tanh %303 : vector<8x128xf32>
    %305 = vector.extract_strided_slice %286 {offsets = [0, 384], sizes = [8, 128], strides = [1, 1]} : vector<8x512xf32> to vector<8x128xf32>
    %cst_109 = arith.constant 5.000000e-01 : f32
    %306 = vector.broadcast %cst_109 : f32 to vector<8x128xf32>
    %307 = arith.mulf %306, %305 : vector<8x128xf32>
    %308 = math.tanh %307 : vector<8x128xf32>
    %cst_110 = arith.constant 5.000000e-01 : f32
    %309 = vector.broadcast %cst_110 : f32 to vector<8x128xf32>
    %310 = arith.mulf %309, %308 : vector<8x128xf32>
    %cst_111 = arith.constant 5.000000e-01 : f32
    %311 = vector.broadcast %cst_111 : f32 to vector<8x128xf32>
    %312 = arith.addf %310, %311 : vector<8x128xf32>
    %313 = arith.mulf %302, %270 : vector<8x128xf32>
    %314 = arith.mulf %294, %304 : vector<8x128xf32>
    %315 = arith.addf %313, %314 : vector<8x128xf32>
    %316 = math.tanh %315 : vector<8x128xf32>
    %317 = arith.mulf %312, %316 : vector<8x128xf32>
    %318 = arith.truncf %317 : vector<8x128xf32> to vector<8x128xbf16>
    %cst_112 = arith.constant dense<0.000000e+00> : vector<8x128xf32>
    %319 = tpu.matmul %318, %4, %cst_112 {dimension_numbers = #tpu.dot_dimension_numbers<[1], [0], [0], [1], [0, 0, 1, 1], [], []>} : vector<8x128xbf16>, vector<128x128xbf16>, vector<8x128xf32> -> vector<8x128xf32>
    %320 = arith.addf %319, %7 : vector<8x128xf32>
    %321 = arith.index_cast %c6_i32 : i32 to index
    %c0_113 = arith.constant 0 : index
    %c0_114 = arith.constant 0 : index
    %322 = vector.load %arg6[%321, %c0_113, %c0_114] : memref<8x8x128xf32, #tpu.memory_space<vmem>>, vector<1x8x128xf32>
    %323 = vector.shape_cast %322 : vector<1x8x128xf32> to vector<8x128xf32>
    %324 = vector.shape_cast %320 : vector<8x128xf32> to vector<1x8x128xf32>
    tpu.vector_store %arg6[%321, %c0_113, %c0_114], %324 {strides = array<i32>} : memref<8x8x128xf32, #tpu.memory_space<vmem>>, vector<1x8x128xf32>,
    %c7_i32 = arith.constant 7 : i32
    %325 = arith.truncf %317 : vector<8x128xf32> to vector<8x128xbf16>
    %326 = arith.index_cast %c7_i32 : i32 to index
    %c0_115 = arith.constant 0 : index
    %c0_116 = arith.constant 0 : index
    %327 = vector.load %arg2[%326, %c0_115, %c0_116] : memref<8x8x512xbf16, #tpu.memory_space<vmem>>, vector<1x8x512xbf16>
    %328 = vector.shape_cast %327 : vector<1x8x512xbf16> to vector<8x512xbf16>
    %329 = arith.extf %328 : vector<8x512xbf16> to vector<8x512xf32>
    %cst_117 = arith.constant dense<0.000000e+00> : vector<8x512xf32>
    %330 = tpu.matmul %325, %3, %cst_117 {dimension_numbers = #tpu.dot_dimension_numbers<[1], [0], [0], [1], [0, 0, 1, 1], [], []>} : vector<8x128xbf16>, vector<128x512xbf16>, vector<8x512xf32> -> vector<8x512xf32>
    %331 = arith.addf %329, %330 : vector<8x512xf32>
    %332 = vector.extract_strided_slice %331 {offsets = [0, 0], sizes = [8, 128], strides = [1, 1]} : vector<8x512xf32> to vector<8x128xf32>
    %cst_118 = arith.constant 5.000000e-01 : f32
    %333 = vector.broadcast %cst_118 : f32 to vector<8x128xf32>
    %334 = arith.mulf %333, %332 : vector<8x128xf32>
    %335 = math.tanh %334 : vector<8x128xf32>
    %cst_119 = arith.constant 5.000000e-01 : f32
    %336 = vector.broadcast %cst_119 : f32 to vector<8x128xf32>
    %337 = arith.mulf %336, %335 : vector<8x128xf32>
    %cst_120 = arith.constant 5.000000e-01 : f32
    %338 = vector.broadcast %cst_120 : f32 to vector<8x128xf32>
    %339 = arith.addf %337, %338 : vector<8x128xf32>
    %340 = vector.extract_strided_slice %331 {offsets = [0, 128], sizes = [8, 128], strides = [1, 1]} : vector<8x512xf32> to vector<8x128xf32>
    %cst_121 = arith.constant 5.000000e-01 : f32
    %341 = vector.broadcast %cst_121 : f32 to vector<8x128xf32>
    %342 = arith.mulf %341, %340 : vector<8x128xf32>
    %343 = math.tanh %342 : vector<8x128xf32>
    %cst_122 = arith.constant 5.000000e-01 : f32
    %344 = vector.broadcast %cst_122 : f32 to vector<8x128xf32>
    %345 = arith.mulf %344, %343 : vector<8x128xf32>
    %cst_123 = arith.constant 5.000000e-01 : f32
    %346 = vector.broadcast %cst_123 : f32 to vector<8x128xf32>
    %347 = arith.addf %345, %346 : vector<8x128xf32>
    %348 = vector.extract_strided_slice %331 {offsets = [0, 256], sizes = [8, 128], strides = [1, 1]} : vector<8x512xf32> to vector<8x128xf32>
    %349 = math.tanh %348 : vector<8x128xf32>
    %350 = vector.extract_strided_slice %331 {offsets = [0, 384], sizes = [8, 128], strides = [1, 1]} : vector<8x512xf32> to vector<8x128xf32>
    %cst_124 = arith.constant 5.000000e-01 : f32
    %351 = vector.broadcast %cst_124 : f32 to vector<8x128xf32>
    %352 = arith.mulf %351, %350 : vector<8x128xf32>
    %353 = math.tanh %352 : vector<8x128xf32>
    %cst_125 = arith.constant 5.000000e-01 : f32
    %354 = vector.broadcast %cst_125 : f32 to vector<8x128xf32>
    %355 = arith.mulf %354, %353 : vector<8x128xf32>
    %cst_126 = arith.constant 5.000000e-01 : f32
    %356 = vector.broadcast %cst_126 : f32 to vector<8x128xf32>
    %357 = arith.addf %355, %356 : vector<8x128xf32>
    %358 = arith.mulf %347, %315 : vector<8x128xf32>
    %359 = arith.mulf %339, %349 : vector<8x128xf32>
    %360 = arith.addf %358, %359 : vector<8x128xf32>
    %361 = math.tanh %360 : vector<8x128xf32>
    %362 = arith.mulf %357, %361 : vector<8x128xf32>
    %363 = arith.truncf %362 : vector<8x128xf32> to vector<8x128xbf16>
    %cst_127 = arith.constant dense<0.000000e+00> : vector<8x128xf32>
    %364 = tpu.matmul %363, %4, %cst_127 {dimension_numbers = #tpu.dot_dimension_numbers<[1], [0], [0], [1], [0, 0, 1, 1], [], []>} : vector<8x128xbf16>, vector<128x128xbf16>, vector<8x128xf32> -> vector<8x128xf32>
    %365 = arith.addf %364, %7 : vector<8x128xf32>
    %366 = arith.index_cast %c7_i32 : i32 to index
    %c0_128 = arith.constant 0 : index
    %c0_129 = arith.constant 0 : index
    %367 = vector.load %arg6[%366, %c0_128, %c0_129] : memref<8x8x128xf32, #tpu.memory_space<vmem>>, vector<1x8x128xf32>
    %368 = vector.shape_cast %367 : vector<1x8x128xf32> to vector<8x128xf32>
    %369 = vector.shape_cast %365 : vector<8x128xf32> to vector<1x8x128xf32>
    tpu.vector_store %arg6[%366, %c0_128, %c0_129], %369 {strides = array<i32>} : memref<8x8x128xf32, #tpu.memory_space<vmem>>, vector<1x8x128xf32>,
    %c8_i32 = arith.constant 8 : i32
    %c0_130 = arith.constant 0 : index
    %c0_131 = arith.constant 0 : index
    %370 = vector.load %arg7[%c0_130, %c0_131] : memref<8x128xf32, #tpu.memory_space<vmem>>, vector<8x128xf32>
    tpu.vector_store %arg7[%c0_130, %c0_131], %362 {strides = array<i32>} : memref<8x128xf32, #tpu.memory_space<vmem>>, vector<8x128xf32>,
    %c0_132 = arith.constant 0 : index
    %c0_133 = arith.constant 0 : index
    %371 = vector.load %arg8[%c0_132, %c0_133] : memref<8x128xf32, #tpu.memory_space<vmem>>, vector<8x128xf32>
    tpu.vector_store %arg8[%c0_132, %c0_133], %360 {strides = array<i32>} : memref<8x128xf32, #tpu.memory_space<vmem>>, vector<8x128xf32>,
    return
  }
  func.func @transform_0(%arg0: i32, %arg1: i32) -> (i32, i32, i32) {
    %c0_i32 = arith.constant 0 : i32
    %c0_i32_0 = arith.constant 0 : i32
    return %arg1, %arg0, %c0_i32 : i32, i32, i32
  }
  func.func @transform_1(%arg0: i32, %arg1: i32) -> (i32, i32) {
    %c0_i32 = arith.constant 0 : i32
    %c0_i32_0 = arith.constant 0 : i32
    %c0_i32_1 = arith.constant 0 : i32
    return %c0_i32, %c0_i32_0 : i32, i32
  }
  func.func @transform_2(%arg0: i32, %arg1: i32) -> (i32, i32) {
    %c0_i32 = arith.constant 0 : i32
    %c0_i32_0 = arith.constant 0 : i32
    %c0_i32_1 = arith.constant 0 : i32
    return %c0_i32, %c0_i32_0 : i32, i32
  }
  func.func @transform_3(%arg0: i32, %arg1: i32) -> (i32, i32) {
    %c0_i32 = arith.constant 0 : i32
    %c0_i32_0 = arith.constant 0 : i32
    %c0_i32_1 = arith.constant 0 : i32
    return %c0_i32, %c0_i32_0 : i32, i32
  }
  func.func @transform_4(%arg0: i32, %arg1: i32) -> (i32, i32, i32) {
    %c0_i32 = arith.constant 0 : i32
    %c0_i32_0 = arith.constant 0 : i32
    return %arg1, %arg0, %c0_i32 : i32, i32, i32
  }
}

</mosaic_0001>

<bundles_post_ra>
// kernel: spn_forward.2
= control target key start
LH: loop header
LB: loop body
LE: loop exit
PB: predicated region body
PF: predicated region fallthrough
CT: control target
= control target key end

     0   :  { %v26_v0 = vlaneseq  ;;  %v425_v2 = vmov 1983009808   ;;  %v426_v4 = vmov 0   ;;  %vm97_vm0 = vcmask 1041408   ;;  %s561_s1 = inlined_call_operand.vmem [shape: bf16[4,512], index: 1, kind: input, shape index: {}]   ;;  %s562_s0 = inlined_call_operand.vmem [shape: bf16[64,4], index: 0, kind: input, shape index: {}]   ;;  %s563_s2 = inlined_call_operand.vmem [shape: f32[1,512], index: 2, kind: input, shape index: {}]   ;;  %s564_s3 = inlined_call_operand.vmem [shape: bf16[64,512], index: 3, kind: output, shape index: {}]  }
   0x1   :  { %v23_v1 = vld [vmem:[%s561_s1] sm:$0xff]  ;;  %v69_v3 = vunpack.c.l.s4 %v425_v2  ;;  %142 = vmatprep.mubr.bf16.mxu0 %v426_v4  ;;  %215 = vmatprep.mubr.bf16.mxu1 %v426_v4  ;;  %vm84_vm1 = vcmask 31744   ;;  %v422_v16 = vld [vmem:[%s562_s0 + $0x8] sm:$0xff]   ;;  %v423_v17 = vld [vmem:[%s562_s0 + $0x10] sm:$0xff]  }
   0x2   :  { %v27_v5 = vshrl.u32 %v26_v0, 7  ;;  %v67_v7 = vcombine.high %v23_v1, %v23_v1  ;;  %v421_v15 = vld [vmem:[%s562_s0] sm:$0xff]   ;;  %v424_v18 = vld [vmem:[%s562_s0 + $0x18] sm:$0xff]  }
   0x3   :  { %v70_v6 = vunpack.c.0.s8 %v69_v3  ;;  %v24_v23 = vld [vmem:[%s563_s2] sm:$0xf] }
   0x4   :  { %v28_v19 = vsub.s32 0, %v27_v5  ;;  %v36_v20 = vsub.s32 2, %v27_v5  ;;  %v32_v21 = vsub.s32 1, %v27_v5  ;;  %v40_v22 = vsub.s32 3, %v27_v5 }
   0x5   :  { %v73_v8 = vsub.s32 %v70_v6, %v27_v5 }
   0x6   :  { %v473_v24 = vrot.slane %v24_v23, %v28_v19  ;;  %v475_v25 = vrot.slane %v24_v23, %v36_v20  ;;  %v477_v26 = vrot.slane %v24_v23, %v32_v21  ;;  %v479_v27 = vrot.slane %v24_v23, %v40_v22 }
   0x7   :  { %v74_v9 = vrot.slane %v23_v1, %v73_v8  ;;  %v81_v10 = vrot.slane %v67_v7, %v73_v8 }
   0x9   :  { %v82_v11 = vcombine.high %v74_v9, %v74_v9  ;;  %v83_v12 = vcombine.high %v81_v10, %v81_v10  ;;  %v99_v13 = vsel %vm97_vm0, %v74_v9, 0  ;;  %v105_v14 = vsel %vm97_vm0, %v81_v10, 0 }
   0xb   :  { %376 = vmatprep.subr.msk.bf16.mxu0 %vm97_vm0, %v82_v11  ;;  %381 = vmatprep.subr.msk.bf16.mxu1 %vm97_vm0, %v83_v12 }
   0xc   :  { %125 = vmatpush1.bf16.msra.mxu0 %v99_v13  ;;  %198 = vmatpush1.bf16.msra.mxu1 %v105_v14 }
   0xf   :  { %377 = vmatmul.mubr.msk.bf16.vlgmr.msra.gmra.mxu0 %vm84_vm1, %v421_v15  ;;  %382 = vmatmul.mubr.msk.bf16.vlgmr.msra.gmra.mxu1 %vm84_vm1, %v421_v15 }
  0x10   :  { %152 = vmatprep.mubr.bf16.mxu0 %v426_v4  ;;  %225 = vmatprep.mubr.bf16.mxu1 %v426_v4 }
  0x17   :  { %378 = vmatmul.mubr.msk.bf16.gmra.mxu0 %vm84_vm1, %v422_v16  ;;  %383 = vmatmul.mubr.msk.bf16.gmra.mxu1 %vm84_vm1, %v422_v16 }
  0x18   :  { %162 = vmatprep.mubr.bf16.mxu0 %v426_v4  ;;  %235 = vmatprep.mubr.bf16.mxu1 %v426_v4 }
  0x1f   :  { %379 = vmatmul.mubr.msk.bf16.gmra.mxu0 %vm84_vm1, %v423_v17  ;;  %384 = vmatmul.mubr.msk.bf16.gmra.mxu1 %vm84_vm1, %v423_v17 }
  0x20   :  { %172 = vmatprep.mubr.bf16.mxu0 %v426_v4  ;;  %245 = vmatprep.mubr.bf16.mxu1 %v426_v4 }
  0x27   :  { %380 = vmatmul.mubr.msk.bf16.gmra.mxu0 %vm84_vm1, %v424_v18  ;;  %385 = vmatmul.mubr.msk.bf16.gmra.mxu1 %vm84_vm1, %v424_v18 }
  0xcf   :  { %v144_v28 = vpop.f32.mrf.mxu0  ;;  %v217_v29 = vpop.f32.mrf.mxu1 }
  0xd0   :  { %v145_v32 = vadd.f32 %v144_v28, %v473_v24  ;;  %v218_v33 = vadd.f32 %v217_v29, %v475_v25 }
  0xd1   :  { %v146_v30 = vpop.f32.mrf.mxu0  ;;  %v219_v31 = vpop.f32.mrf.mxu1 }
  0xd2   :  { %v147_v34 = vadd.f32 %v146_v30, %v477_v26  ;;  %v220_v35 = vadd.f32 %v219_v31, %v479_v27 }
  0xd3   :  { %v148_v36 = vpop.f32.mrf.mxu0  ;;  %v221_v37 = vpop.f32.mrf.mxu1 }
  0xd4   :  { %v402_v38 = vpack.c.bf16 %v147_v34, %v145_v32  ;;  %v403_v39 = vpack.c.bf16 %v220_v35, %v218_v33  ;;  %v149_v42 = vadd.f32 %v148_v36, %v473_v24  ;;  %v222_v43 = vadd.f32 %v221_v37, %v475_v25 }
  0xd5   :  { %v150_v40 = vpop.f32.mrf.mxu0  ;;  %v223_v41 = vpop.f32.mrf.mxu1 }
  0xd6   :  { %352 = vst [vmem:[%s564_s3] sm:$0xff] %v402_v38  ;;  %353 = vst [vmem:[%s564_s3 + $0x8] sm:$0xff] %v403_v39  ;;  %v151_v44 = vadd.f32 %v150_v40, %v477_v26  ;;  %v224_v45 = vadd.f32 %v223_v41, %v479_v27 }
  0xd7   :  { %v154_v46 = vpop.f32.mrf.mxu0  ;;  %v227_v47 = vpop.f32.mrf.mxu1 }
  0xd8   :  { %v404_v48 = vpack.c.bf16 %v151_v44, %v149_v42  ;;  %v405_v49 = vpack.c.bf16 %v224_v45, %v222_v43  ;;  %v155_v52 = vadd.f32 %v154_v46, %v473_v24  ;;  %v228_v53 = vadd.f32 %v227_v47, %v475_v25 }
  0xd9   :  { %v156_v50 = vpop.f32.mrf.mxu0  ;;  %v229_v51 = vpop.f32.mrf.mxu1 }
  0xda   :  { %354 = vst [vmem:[%s564_s3 + $0x10] sm:$0xff] %v404_v48  ;;  %355 = vst [vmem:[%s564_s3 + $0x18] sm:$0xff] %v405_v49  ;;  %v157_v54 = vadd.f32 %v156_v50, %v477_v26  ;;  %v230_v55 = vadd.f32 %v229_v51, %v479_v27 }
  0xdb   :  { %v158_v56 = vpop.f32.mrf.mxu0  ;;  %v231_v57 = vpop.f32.mrf.mxu1 }
  0xdc   :  { %v406_v58 = vpack.c.bf16 %v157_v54, %v155_v52  ;;  %v407_v59 = vpack.c.bf16 %v230_v55, %v228_v53  ;;  %v159_v62 = vadd.f32 %v158_v56, %v473_v24  ;;  %v232_v63 = vadd.f32 %v231_v57, %v475_v25 }
  0xdd   :  { %v160_v60 = vpop.f32.mrf.mxu0  ;;  %v233_v61 = vpop.f32.mrf.mxu1 }
  0xde   :  { %356 = vst [vmem:[%s564_s3 + $0x20] sm:$0xff] %v406_v58  ;;  %357 = vst [vmem:[%s564_s3 + $0x28] sm:$0xff] %v407_v59  ;;  %v161_v0 = vadd.f32 %v160_v60, %v477_v26  ;;  %v234_v1 = vadd.f32 %v233_v61, %v479_v27 }
  0xdf   :  { %v164_v2 = vpop.f32.mrf.mxu0  ;;  %v237_v3 = vpop.f32.mrf.mxu1 }
  0xe0   :  { %v408_v4 = vpack.c.bf16 %v161_v0, %v159_v62  ;;  %v409_v5 = vpack.c.bf16 %v234_v1, %v232_v63  ;;  %v165_v8 = vadd.f32 %v164_v2, %v473_v24  ;;  %v238_v9 = vadd.f32 %v237_v3, %v475_v25 }
  0xe1   :  { %v166_v6 = vpop.f32.mrf.mxu0  ;;  %v239_v7 = vpop.f32.mrf.mxu1 }
  0xe2   :  { %358 = vst [vmem:[%s564_s3 + $0x30] sm:$0xff] %v408_v4  ;;  %359 = vst [vmem:[%s564_s3 + $0x38] sm:$0xff] %v409_v5  ;;  %v167_v10 = vadd.f32 %v166_v6, %v477_v26  ;;  %v240_v11 = vadd.f32 %v239_v7, %v479_v27 }
  0xe3   :  { %v168_v12 = vpop.f32.mrf.mxu0  ;;  %v241_v13 = vpop.f32.mrf.mxu1 }
  0xe4   :  { %v410_v14 = vpack.c.bf16 %v167_v10, %v165_v8  ;;  %v411_v15 = vpack.c.bf16 %v240_v11, %v238_v9  ;;  %v169_v18 = vadd.f32 %v168_v12, %v473_v24  ;;  %v242_v19 = vadd.f32 %v241_v13, %v475_v25 }
  0xe5   :  { %v170_v16 = vpop.f32.mrf.mxu0  ;;  %v243_v17 = vpop.f32.mrf.mxu1 }
  0xe6   :  { %360 = vst [vmem:[%s564_s3 + $0x40] sm:$0xff] %v410_v14  ;;  %361 = vst [vmem:[%s564_s3 + $0x48] sm:$0xff] %v411_v15  ;;  %v171_v20 = vadd.f32 %v170_v16, %v477_v26  ;;  %v244_v21 = vadd.f32 %v243_v17, %v479_v27 }
  0xe7   :  { %v174_v22 = vpop.f32.mrf.mxu0  ;;  %v247_v23 = vpop.f32.mrf.mxu1 }
  0xe8   :  { %v412_v28 = vpack.c.bf16 %v171_v20, %v169_v18  ;;  %v413_v29 = vpack.c.bf16 %v244_v21, %v242_v19  ;;  %v175_v32 = vadd.f32 %v174_v22, %v473_v24  ;;  %v248_v33 = vadd.f32 %v247_v23, %v475_v25 }
  0xe9   :  { %v176_v30 = vpop.f32.mrf.mxu0  ;;  %v249_v31 = vpop.f32.mrf.mxu1 }
  0xea   :  { %362 = vst [vmem:[%s564_s3 + $0x50] sm:$0xff] %v412_v28  ;;  %363 = vst [vmem:[%s564_s3 + $0x58] sm:$0xff] %v413_v29  ;;  %v177_v34 = vadd.f32 %v176_v30, %v477_v26  ;;  %v250_v35 = vadd.f32 %v249_v31, %v479_v27 }
  0xeb   :  { %v178_v36 = vpop.f32.mrf.mxu0  ;;  %v251_v37 = vpop.f32.mrf.mxu1 }
  0xec   :  { %v414_v38 = vpack.c.bf16 %v177_v34, %v175_v32  ;;  %v415_v39 = vpack.c.bf16 %v250_v35, %v248_v33  ;;  %v179_v42 = vadd.f32 %v178_v36, %v473_v24  ;;  %v252_v43 = vadd.f32 %v251_v37, %v475_v25 }
  0xed   :  { %v180_v40 = vpop.f32.mrf.mxu0  ;;  %v253_v41 = vpop.f32.mrf.mxu1 }
  0xee   :  { %364 = vst [vmem:[%s564_s3 + $0x60] sm:$0xff] %v414_v38  ;;  %365 = vst [vmem:[%s564_s3 + $0x68] sm:$0xff] %v415_v39  ;;  %v181_v44 = vadd.f32 %v180_v40, %v477_v26  ;;  %v254_v45 = vadd.f32 %v253_v41, %v479_v27 }
  0xf0   :  { %v416_v46 = vpack.c.bf16 %v181_v44, %v179_v42  ;;  %v417_v47 = vpack.c.bf16 %v254_v45, %v252_v43 }
  0xf2   :  { %366 = vst [vmem:[%s564_s3 + $0x70] sm:$0xff] %v416_v46  ;;  %367 = vst [vmem:[%s564_s3 + $0x78] sm:$0xff] %v417_v47 }

// kernel: spn_forward.3
= control target key start
LH: loop header
LB: loop body
LE: loop exit
PB: predicated region body
PF: predicated region fallthrough
CT: control target
= control target key end

     0   :  { %9 = vsyncpa [#allocation5], 0  ;;  %s2041_s15 = smov [#allocation4]   ;;  %s2818_s0 = inlined_call_operand.vmem [shape: bf16[8,8,512], index: 0, kind: input, shape index: {}]   ;;  %s2819_s1 = inlined_call_operand.hbm [shape: bf16[128,512], index: 1, kind: input, shape index: {}]   ;;  %s2820_s2 = inlined_call_operand.vmem [shape: bf16[128,128], index: 2, kind: input, shape index: {}]   ;;  %s2821_s3 = inlined_call_operand.vmem [shape: f32[1,128], index: 3, kind: input, shape index: {}]   ;;  %s2822_s4 = inlined_call_operand.vmem [shape: f32[8,8,128], index: 4, kind: output, shape index: {}]  }
   0x1   :  { %s17_s16 = sshll.u32 %s2041_s15, 4  ;;  %s18_s16 = int_to_ptr.vmem [resolvable:$true] %s17_s16 }
   0x2   :  { %s2027_s17 = scalar_lea.vmem %s18_s16, 4096  ;;  %p2032_p1 = scmp.lt.s32.totalorder %s18_s16, %s18_s16 }
   0x3   :  { %p2028_p0 = scmp.ne.s32.totalorder %s18_s16, %s2027_s17  ;;  %p2033_p2 = scmp.lt.s32.totalorder %s2027_s17, %s2027_s17 }
   0x5   :  { %p2034_p3 = por %p2033_p2, %p2032_p1 }
   0x7   :  { %p2035_p4 = pnand %p2034_p3, %p2028_p0 }
   0x9   :  { %2038 = shalt.err (!%p2035_p4)
}
   0xa   :  { %s2042_s18 = smov 256   ;;  %s2043_s19 = smov 16  }
   0xb   :  { %23 = dma.hbm_to_vmem [thread:$0]  %s2819_s1, 4096, %s18_s16, [#allocation5], %s2042_s18, %s2042_s18, %s2043_s19  }
   0xc   :  { %2039 = dma.done.wait [#allocation5], 4096  }
   0xd   :  { %2040 = vsyncadd [#allocation5], 4294963200  ;;  %v2044_v0 = vmov 0   ;;  %v2078_v1 = vld [vmem:[#allocation4 + $0xe4] ss:$16 sps:$4 sm:$0xff]   ;;  %v2045_v33 = vmov 0.0|0.0  }
   0xe   :  { %294 = vmatprep.mubr.bf16.mxu0 %v2044_v0  ;;  %335 = vmatprep.mubr.bf16.mxu1 %v2044_v0  ;;  %v2080_v2 = vld [vmem:[#allocation4 + $0xe0] ss:$16 sps:$4 sm:$0xff]   ;;  %v2083_v3 = vld [vmem:[#allocation4 + $0xec] ss:$16 sps:$4 sm:$0xff]   ;;  %v2085_v4 = vld [vmem:[#allocation4 + $0xe8] ss:$16 sps:$4 sm:$0xff]  }
   0xf   :  { %262 = vmatprep.subr.bf16.mxu0 %v2078_v1  ;;  %v2088_v5 = vld [vmem:[#allocation4 + $0xc4] ss:$16 sps:$4 sm:$0xff]   ;;  %v2090_v6 = vld [vmem:[#allocation4 + $0xc0] ss:$16 sps:$4 sm:$0xff]   ;;  %303 = vmatprep.subr.bf16.mxu1 %v2083_v3  ;;  %v2093_v7 = vld [vmem:[#allocation4 + $0xcc] ss:$16 sps:$4 sm:$0xff]  }
  0x10   :  { %263 = vmatpush1.bf16.msra.mxu0 %v2080_v2  ;;  %304 = vmatpush1.bf16.msra.mxu1 %v2085_v4  ;;  %v2097_v8 = vld [vmem:[#allocation4 + $0xc8] ss:$16 sps:$4 sm:$0xff]   ;;  %v2100_v9 = vld [vmem:[#allocation4 + $0xa4] ss:$16 sps:$4 sm:$0xff]   ;;  %v2103_v10 = vld [vmem:[#allocation4 + $0xa0] ss:$16 sps:$4 sm:$0xff]  }
  0x11   :  { %264 = vmatprep.subr.bf16.mxu0 %v2088_v5  ;;  %305 = vmatprep.subr.bf16.mxu1 %v2093_v7  ;;  %v2105_v11 = vld [vmem:[#allocation4 + $0xac] ss:$16 sps:$4 sm:$0xff]   ;;  %v2108_v12 = vld [vmem:[#allocation4 + $0x84] ss:$16 sps:$4 sm:$0xff]   ;;  %v2111_v13 = vld [vmem:[#allocation4 + $0xa8] ss:$16 sps:$4 sm:$0xff]  }
  0x12   :  { %v2114_v14 = vld [vmem:[#allocation4 + $0x8c] ss:$16 sps:$4 sm:$0xff]   ;;  %v2117_v15 = vld [vmem:[#allocation4 + $0x80] ss:$16 sps:$4 sm:$0xff]   ;;  %v2120_v16 = vld [vmem:[#allocation4 + $0x64] ss:$16 sps:$4 sm:$0xff]  }
  0x13   :  { %v2123_v17 = vld [vmem:[#allocation4 + $0x88] ss:$16 sps:$4 sm:$0xff]   ;;  %v2126_v18 = vld [vmem:[#allocation4 + $0x6c] ss:$16 sps:$4 sm:$0xff]   ;;  %v2129_v19 = vld [vmem:[#allocation4 + $0x60] ss:$16 sps:$4 sm:$0xff]  }
  0x14   :  { %265 = vmatpush1.bf16.msra.mxu0 %v2090_v6  ;;  %306 = vmatpush1.bf16.msra.mxu1 %v2097_v8  ;;  %v2132_v20 = vld [vmem:[#allocation4 + $0x44] ss:$16 sps:$4 sm:$0xff]   ;;  %v2135_v21 = vld [vmem:[#allocation4 + $0x68] ss:$16 sps:$4 sm:$0xff]   ;;  %v2138_v22 = vld [vmem:[#allocation4 + $0x4c] ss:$16 sps:$4 sm:$0xff]  }
  0x15   :  { %266 = vmatprep.subr.bf16.mxu0 %v2100_v9  ;;  %307 = vmatprep.subr.bf16.mxu1 %v2105_v11  ;;  %v2141_v23 = vld [vmem:[#allocation4 + $0x40] ss:$16 sps:$4 sm:$0xff]   ;;  %v2143_v24 = vld [vmem:[#allocation4 + $0x48] ss:$16 sps:$4 sm:$0xff]   ;;  %v2146_v25 = vld [vmem:[#allocation4 + $0x24] ss:$16 sps:$4 sm:$0xff]  }
  0x16   :  { %v2149_v26 = vld [vmem:[#allocation4 + $0x20] ss:$16 sps:$4 sm:$0xff]   ;;  %v2151_v27 = vld [vmem:[#allocation4 + $0x2c] ss:$16 sps:$4 sm:$0xff]   ;;  %v2154_v28 = vld [vmem:[#allocation4 + $0x4] ss:$16 sps:$4 sm:$0xff]  }
  0x17   :  { %v2157_v29 = vld [vmem:[#allocation4 + $0x28] ss:$16 sps:$4 sm:$0xff]   ;;  %v2160_v30 = vld [vmem:[#allocation4 + $0xc] ss:$16 sps:$4 sm:$0xff]   ;;  %v2165_v31 = vld [vmem:[#allocation4] ss:$16 sps:$4 sm:$0xff]  }
  0x18   :  { %267 = vmatpush1.bf16.msra.mxu0 %v2103_v10  ;;  %308 = vmatpush1.bf16.msra.mxu1 %v2111_v13  ;;  %v2169_v32 = vld [vmem:[#allocation4 + $0x8] ss:$16 sps:$4 sm:$0xff]   ;;  %v2823_v35 = vmov 0.0   ;;  %v2203_v36 = vld [vmem:[%s2820_s2 + $0x30] sm:$0xff]   ;;  %v2217_v38 = vld [vmem:[%s2820_s2 + $0x20] sm:$0xff]   ;;  %vm2047_vm0 = vmmov 0  }
  0x19   :  { %268 = vmatprep.subr.bf16.mxu0 %v2108_v12  ;;  %309 = vmatprep.subr.bf16.mxu1 %v2114_v14  ;;  %v2194_v34 = vld [vmem:[%s2820_s2 + $0x38] sm:$0xff]   ;;  %v2210_v37 = vld [vmem:[%s2820_s2 + $0x28] sm:$0xff]   ;;  %v2231_v40 = vld [vmem:[%s2820_s2 + $0x10] sm:$0xff]  }
  0x1a   :  { %v2224_v39 = vld [vmem:[%s2820_s2 + $0x18] sm:$0xff]   ;;  %v2238_v41 = vld [vmem:[%s2820_s2 + $0x8] sm:$0xff]   ;;  %v2245_v42 = vld [vmem:[%s2820_s2] sm:$0xff]  }
  0x1b   :  { %v96_v43 = vld [vmem:[%s2818_s0] sm:$0xff]  ;;  %v97_v45 = vld [vmem:[%s2818_s0 + $0x8] sm:$0xff] }
  0x1c   :  { %269 = vmatpush1.bf16.msra.mxu0 %v2117_v15  ;;  %310 = vmatpush1.bf16.msra.mxu1 %v2123_v17  ;;  %v98_v44 = vunpack.c.l.bf16 %v96_v43  ;;  %v99_v46 = vunpack.c.h.bf16 %v96_v43  ;;  %v100_v49 = vunpack.c.l.bf16 %v97_v45  ;;  %v101_v61 = vunpack.c.h.bf16 %v97_v45 }
  0x1d   :  { %270 = vmatprep.subr.bf16.mxu0 %v2120_v16  ;;  %311 = vmatprep.subr.bf16.mxu1 %v2126_v18 }
  0x20   :  { %271 = vmatpush1.bf16.msra.mxu0 %v2129_v19  ;;  %312 = vmatpush1.bf16.msra.mxu1 %v2135_v21 }
  0x21   :  { %272 = vmatprep.subr.bf16.mxu0 %v2132_v20  ;;  %313 = vmatprep.subr.bf16.mxu1 %v2138_v22 }
  0x24   :  { %273 = vmatpush1.bf16.msra.mxu0 %v2141_v23  ;;  %314 = vmatpush1.bf16.msra.mxu1 %v2143_v24 }
  0x25   :  { %274 = vmatprep.subr.bf16.mxu0 %v2146_v25  ;;  %315 = vmatprep.subr.bf16.mxu1 %v2151_v27 }
  0x28   :  { %275 = vmatpush1.bf16.msra.mxu0 %v2149_v26  ;;  %316 = vmatpush1.bf16.msra.mxu1 %v2157_v29 }
  0x29   :  { %276 = vmatprep.subr.bf16.mxu0 %v2154_v28  ;;  %317 = vmatprep.subr.bf16.mxu1 %v2160_v30 }
  0x2c   :  { %277 = vmatpush1.bf16.msra.mxu0 %v2165_v31  ;;  %318 = vmatpush1.bf16.msra.mxu1 %v2169_v32 }
  0x2d   :  { %463 = vmatprep.subr.bf16.mxu1 %v2078_v1  ;;  %1675 = vmatprep.subr.bf16.mxu0 %v2823_v35 }
  0x2f   :  { %295 = vmatmul.mubr.bf16.vlgmr.msra.gmra.mxu0 %v2045_v33  ;;  %336 = vmatmul.mubr.bf16.vlgmr.msra.gmra.mxu1 %v2045_v33 }
  0x30   :  { %464 = vmatpush1.bf16.msra.mxu1 %v2080_v2  ;;  %495 = vmatprep.mubr.bf16.mxu1 %v2044_v0 }
  0x31   :  { %465 = vmatprep.subr.bf16.mxu1 %v2088_v5  ;;  %1676 = vmatpush3.bf16.msra.mxu0 %v2194_v34 }
  0x32   :  { %1677 = vmatprep.subr.bf16.mxu0 %v2823_v35  ;;  %1691 = vmatprep.mubr.msk.bf16.mxu0 %vm2047_vm0, %v2823_v35 }
  0x34   :  { %466 = vmatpush1.bf16.msra.mxu1 %v2090_v6 }
  0x35   :  { %467 = vmatprep.subr.bf16.mxu1 %v2100_v9  ;;  %1678 = vmatpush3.bf16.msra.mxu0 %v2203_v36 }
  0x36   :  { %1679 = vmatprep.subr.bf16.mxu0 %v2823_v35 }
  0x38   :  { %468 = vmatpush1.bf16.msra.mxu1 %v2103_v10 }
  0x39   :  { %469 = vmatprep.subr.bf16.mxu1 %v2108_v12  ;;  %1680 = vmatpush3.bf16.msra.mxu0 %v2210_v37 }
  0x3a   :  { %1681 = vmatprep.subr.bf16.mxu0 %v2823_v35 }
  0x3c   :  { %470 = vmatpush1.bf16.msra.mxu1 %v2117_v15 }
  0x3d   :  { %471 = vmatprep.subr.bf16.mxu1 %v2120_v16  ;;  %1682 = vmatpush3.bf16.msra.mxu0 %v2217_v38 }
  0x3e   :  { %1683 = vmatprep.subr.bf16.mxu0 %v2823_v35 }
  0x40   :  { %472 = vmatpush1.bf16.msra.mxu1 %v2129_v19 }
  0x41   :  { %473 = vmatprep.subr.bf16.mxu1 %v2132_v20  ;;  %1684 = vmatpush3.bf16.msra.mxu0 %v2224_v39 }
  0x42   :  { %1685 = vmatprep.subr.bf16.mxu0 %v2823_v35 }
  0x44   :  { %474 = vmatpush1.bf16.msra.mxu1 %v2141_v23 }
  0x45   :  { %475 = vmatprep.subr.bf16.mxu1 %v2146_v25  ;;  %1686 = vmatpush3.bf16.msra.mxu0 %v2231_v40 }
  0x46   :  { %1687 = vmatprep.subr.bf16.mxu0 %v2823_v35 }
  0x48   :  { %476 = vmatpush1.bf16.msra.mxu1 %v2149_v26 }
  0x49   :  { %477 = vmatprep.subr.bf16.mxu1 %v2154_v28  ;;  %1688 = vmatpush3.bf16.msra.mxu0 %v2238_v41 }
  0x4a   :  { %1689 = vmatprep.subr.bf16.mxu0 %v2823_v35 }
  0x4c   :  { %478 = vmatpush1.bf16.msra.mxu1 %v2165_v31 }
  0x4d   :  { %1695 = vmatprep.subr.bf16.mxu1 %v2823_v35  ;;  %1690 = vmatpush3.bf16.msra.mxu0 %v2245_v42 }
  0x4e   :  { %504 = vmatprep.subr.bf16.mxu0 %v2083_v3 }
  0xef   :  { %v296_v47 = vpop.f32.mrf.mxu0  ;;  %v337_v51 = vpop.f32.mrf.mxu1 }
  0xf0   :  { %v344_v48 = vadd.f32 %v296_v47, %v98_v44  ;;  %v346_v57 = vadd.f32 %v337_v51, %v100_v49 }
  0xf1   :  { %v298_v50 = vpop.f32.mrf.mxu0  ;;  %v339_v55 = vpop.f32.mrf.mxu1 }
  0xf2   :  { %v348_v52 = vmul.f32 0.5, %v344_v48  ;;  %v345_v53 = vadd.f32 %v298_v50, %v99_v46  ;;  %v347_v62 = vadd.f32 %v339_v55, %v101_v61 }
  0xf3   :  { %v300_v54 = vpop.f32.mrf.mxu0  ;;  %v341_v59 = vpop.f32.mrf.mxu1 }
  0xf4   :  { %1898 = vtanh.f32 %v348_v52  ;;  %v352_v56 = vmul.f32 0.5, %v345_v53  ;;  %v357_v63 = vmul.f32 0.5, %v347_v62 }
  0xf5   :  { %v301_v58 = vpop.f32.mrf.mxu0  ;;  %v342_v60 = vpop.f32.mrf.mxu1 }
  0xf6   :  { %1900 = vtanh.f32 %v352_v56 }
  0xf7   :  { %1902 = vtanh.f32 %v346_v57  ;;  %v2315_v57 = vld [vmem:[%s2821_s3] ss:$0 sm:$0xff] }
  0xf8   :  { %1904 = vtanh.f32 %v357_v63 }
 0x101   :  { %v1899_v33 = vpop.eup %1898 }
 0x102   :  { %v350_v43 = vmul.f32 0.5, %v1899_v33 }
 0x103   :  { %v1901_v44 = vpop.eup %1900 }
 0x104   :  { %v351_v47 = vadd.f32 0.5, %v350_v43  ;;  %v354_v35 = vmul.f32 0.5, %v1901_v44  ;;  %v1903_v46 = vpop.eup %1902 }
 0x105   :  { %v1905_v49 = vpop.eup %1904 }
 0x106   :  { %v355_v48 = vadd.f32 0.5, %v354_v35  ;;  %v362_v52 = vmul.f32 %v1903_v46, %v351_v47  ;;  %v359_v51 = vmul.f32 0.5, %v1905_v49  ;;  %v2825_v35 = vmov 0.0   ;;  %v1582_v47 = vld [vmem:[%s2818_s0 + $0x10] sm:$0xff] }
 0x107   :  { %v460_v46 = vunpack.c.h.bf16 %v1582_v47 }
 0x108   :  { %v361_v50 = vmul.f32 0.0, %v355_v48  ;;  %v360_v54 = vadd.f32 0.5, %v359_v51  ;;  %v459_v48 = vunpack.c.l.bf16 %v1582_v47 }
 0x10a   :  { %v2257_v53 = vadd.f32 %v362_v52, %v361_v50 }
 0x10c   :  { %1906 = vtanh.f32 %v2257_v53 }
 0x119   :  { %v1907_v45 = vpop.eup %1906 }
 0x11a   :  { %v365_v55 = vmul.f32 %v1907_v45, %v360_v54  ;;  %v1583_v54 = vld [vmem:[%s2818_s0 + $0x18] sm:$0xff] }
 0x11b   :  { %v461_v45 = vunpack.c.l.bf16 %v1583_v54 }
 0x11c   :  { %v366_v56 = vpack.c.bf16 %v365_v55, %v365_v55 }
 0x11e   :  { %1692 = vmatmul.mubr.bf16.vlgmr.msra.gmra.mxu0 %v366_v56  ;;  %496 = vmatmul.mubr.bf16.vlgmr.msra.gmra.mxu1 %v366_v56 }
 0x11f   :  { %505 = vmatpush1.bf16.msra.mxu0 %v2085_v4  ;;  %536 = vmatprep.mubr.bf16.mxu0 %v2044_v0 }
 0x120   :  { %506 = vmatprep.subr.bf16.mxu0 %v2093_v7  ;;  %1696 = vmatpush3.bf16.msra.mxu1 %v2194_v34 }
 0x121   :  { %1697 = vmatprep.subr.bf16.mxu1 %v2825_v35  ;;  %1711 = vmatprep.mubr.msk.bf16.mxu1 %vm2047_vm0, %v2825_v35 }
 0x123   :  { %507 = vmatpush1.bf16.msra.mxu0 %v2097_v8 }
 0x124   :  { %508 = vmatprep.subr.bf16.mxu0 %v2105_v11  ;;  %1698 = vmatpush3.bf16.msra.mxu1 %v2203_v36 }
 0x125   :  { %1699 = vmatprep.subr.bf16.mxu1 %v2825_v35 }
 0x127   :  { %509 = vmatpush1.bf16.msra.mxu0 %v2111_v13 }
 0x128   :  { %510 = vmatprep.subr.bf16.mxu0 %v2114_v14  ;;  %1700 = vmatpush3.bf16.msra.mxu1 %v2210_v37 }
 0x129   :  { %1701 = vmatprep.subr.bf16.mxu1 %v2825_v35 }
 0x12b   :  { %511 = vmatpush1.bf16.msra.mxu0 %v2123_v17 }
 0x12c   :  { %512 = vmatprep.subr.bf16.mxu0 %v2126_v18  ;;  %1702 = vmatpush3.bf16.msra.mxu1 %v2217_v38 }
 0x12d   :  { %1703 = vmatprep.subr.bf16.mxu1 %v2825_v35 }
 0x12f   :  { %513 = vmatpush1.bf16.msra.mxu0 %v2135_v21 }
 0x130   :  { %514 = vmatprep.subr.bf16.mxu0 %v2138_v22  ;;  %1704 = vmatpush3.bf16.msra.mxu1 %v2224_v39 }
 0x131   :  { %1705 = vmatprep.subr.bf16.mxu1 %v2825_v35 }
 0x133   :  { %515 = vmatpush1.bf16.msra.mxu0 %v2143_v24 }
 0x134   :  { %516 = vmatprep.subr.bf16.mxu0 %v2151_v27  ;;  %1706 = vmatpush3.bf16.msra.mxu1 %v2231_v40 }
 0x135   :  { %1707 = vmatprep.subr.bf16.mxu1 %v2825_v35 }
 0x137   :  { %517 = vmatpush1.bf16.msra.mxu0 %v2157_v29 }
 0x138   :  { %518 = vmatprep.subr.bf16.mxu0 %v2160_v30  ;;  %1708 = vmatpush3.bf16.msra.mxu1 %v2238_v41 }
 0x139   :  { %1709 = vmatprep.subr.bf16.mxu1 %v2825_v35 }
 0x13b   :  { %519 = vmatpush1.bf16.msra.mxu0 %v2169_v32 }
 0x13c   :  { %617 = vmatprep.subr.bf16.mxu0 %v2078_v1  ;;  %1710 = vmatpush3.bf16.msra.mxu1 %v2245_v42 }
 0x13d   :  { %658 = vmatprep.subr.bf16.mxu1 %v2083_v3 }
 0x13e   :  { %537 = vmatmul.mubr.bf16.vlgmr.msra.gmra.mxu0 %v366_v56 }
 0x13f   :  { %618 = vmatpush1.bf16.msra.mxu0 %v2080_v2  ;;  %649 = vmatprep.mubr.bf16.mxu0 %v2044_v0 }
 0x140   :  { %619 = vmatprep.subr.bf16.mxu0 %v2088_v5 }
 0x143   :  { %620 = vmatpush1.bf16.msra.mxu0 %v2090_v6 }
 0x144   :  { %621 = vmatprep.subr.bf16.mxu0 %v2100_v9 }
 0x147   :  { %622 = vmatpush1.bf16.msra.mxu0 %v2103_v10 }
 0x148   :  { %623 = vmatprep.subr.bf16.mxu0 %v2108_v12 }
 0x14b   :  { %624 = vmatpush1.bf16.msra.mxu0 %v2117_v15 }
 0x14c   :  { %625 = vmatprep.subr.bf16.mxu0 %v2120_v16 }
 0x14f   :  { %626 = vmatpush1.bf16.msra.mxu0 %v2129_v19 }
 0x150   :  { %627 = vmatprep.subr.bf16.mxu0 %v2132_v20 }
 0x153   :  { %628 = vmatpush1.bf16.msra.mxu0 %v2141_v23 }
 0x154   :  { %629 = vmatprep.subr.bf16.mxu0 %v2146_v25 }
 0x157   :  { %630 = vmatpush1.bf16.msra.mxu0 %v2149_v26 }
 0x158   :  { %631 = vmatprep.subr.bf16.mxu0 %v2154_v28 }
 0x15b   :  { %632 = vmatpush1.bf16.msra.mxu0 %v2165_v31 }
 0x15c   :  { %1715 = vmatprep.subr.bf16.mxu0 %v2825_v35 }
 0x1de   :  { %v449_v58 = vpop.f32.mrf.mxu0  ;;  %v497_v59 = vpop.f32.mrf.mxu1 }
 0x1df   :  { %v450_v60 = vadd.f32 %v2315_v57, %v449_v58  ;;  %v545_v52 = vadd.f32 %v497_v59, %v459_v48  ;;  %v462_v58 = vunpack.c.h.bf16 %v1583_v54 }
 0x1e0   :  { %v1693_v61 = vpop.f32.mrf.mxu0  ;;  %v499_v62 = vpop.f32.mrf.mxu1 }
 0x1e1   :  { %455 = vst [vmem:[%s2822_s4] sm:$0xff] %v450_v60  ;;  %v546_v50 = vadd.f32 %v499_v62, %v460_v46  ;;  %v549_v51 = vmul.f32 0.5, %v545_v52 }
 0x1e2   :  { %v452_v63 = vpop.f32.mrf.mxu0  ;;  %v501_v33 = vpop.f32.mrf.mxu1 }
 0x1e3   :  { %v553_v49 = vmul.f32 0.5, %v546_v50 }
 0x1e4   :  { %v1694_v43 = vpop.f32.mrf.mxu0  ;;  %v502_v44 = vpop.f32.mrf.mxu1 }
 0x1e5   :  { %1908 = vtanh.f32 %v553_v49 }
 0x1e6   :  { %1910 = vtanh.f32 %v549_v51 }
 0x1f2   :  { %v1909_v33 = vpop.eup %1908 }
 0x1f3   :  { %v1911_v62 = vpop.eup %1910  ;;  %v555_v59 = vmul.f32 0.5, %v1909_v33 }
 0x1f4   :  { %v551_v47 = vmul.f32 0.5, %v1911_v62 }
 0x1f5   :  { %v556_v46 = vadd.f32 0.5, %v555_v59 }
 0x1f6   :  { %v552_v48 = vadd.f32 0.5, %v551_v47 }
 0x1f7   :  { %v562_v52 = vmul.f32 %v556_v46, %v2257_v53  ;;  %v1585_v46 = vld [vmem:[%s2818_s0 + $0x20] sm:$0xff] }
 0x1fe   :  { %v538_v55 = vpop.f32.mrf.mxu0 }
 0x1ff   :  { %v547_v56 = vadd.f32 %v538_v55, %v461_v45 }
 0x200   :  { %v540_v60 = vpop.f32.mrf.mxu0 }
 0x201   :  { %1912 = vtanh.f32 %v547_v56  ;;  %v548_v63 = vadd.f32 %v540_v60, %v462_v58 }
 0x202   :  { %v542_v61 = vpop.f32.mrf.mxu0 }
 0x203   :  { %v558_v44 = vmul.f32 0.5, %v548_v63 }
 0x204   :  { %v543_v43 = vpop.f32.mrf.mxu0 }
 0x205   :  { %1914 = vtanh.f32 %v558_v44 }
 0x20e   :  { %v1913_v50 = vpop.eup %1912 }
 0x20f   :  { %v563_v49 = vmul.f32 %v1913_v50, %v552_v48  ;;  %v614_v48 = vunpack.c.h.bf16 %v1585_v46  ;;  %v613_v50 = vunpack.c.l.bf16 %v1585_v46 }
 0x211   :  { %v2328_v51 = vadd.f32 %v563_v49, %v562_v52 }
 0x212   :  { %v1915_v54 = vpop.eup %1914 }
 0x213   :  { %1916 = vtanh.f32 %v2328_v51  ;;  %v560_v45 = vmul.f32 0.5, %v1915_v54 }
 0x215   :  { %v561_v55 = vadd.f32 0.5, %v560_v45 }
 0x220   :  { %v1917_v56 = vpop.eup %1916 }
 0x221   :  { %v566_v58 = vmul.f32 %v1917_v56, %v561_v55  ;;  %v1586_v55 = vld [vmem:[%s2818_s0 + $0x28] sm:$0xff] }
 0x222   :  { %v615_v56 = vunpack.c.l.bf16 %v1586_v55 }
 0x223   :  { %v567_v60 = vpack.c.bf16 %v566_v58, %v566_v58 }
 0x225   :  { %1712 = vmatmul.mubr.bf16.vlgmr.msra.gmra.mxu1 %v567_v60  ;;  %650 = vmatmul.mubr.bf16.vlgmr.msra.gmra.mxu0 %v567_v60 }
 0x226   :  { %659 = vmatpush1.bf16.msra.mxu1 %v2085_v4  ;;  %690 = vmatprep.mubr.bf16.mxu1 %v2044_v0 }
 0x227   :  { %660 = vmatprep.subr.bf16.mxu1 %v2093_v7  ;;  %1716 = vmatpush3.bf16.msra.mxu0 %v2194_v34 }
 0x228   :  { %1717 = vmatprep.subr.bf16.mxu0 %v2825_v35  ;;  %1731 = vmatprep.mubr.msk.bf16.mxu0 %vm2047_vm0, %v2825_v35 }
 0x22a   :  { %661 = vmatpush1.bf16.msra.mxu1 %v2097_v8 }
 0x22b   :  { %662 = vmatprep.subr.bf16.mxu1 %v2105_v11  ;;  %1718 = vmatpush3.bf16.msra.mxu0 %v2203_v36 }
 0x22c   :  { %1719 = vmatprep.subr.bf16.mxu0 %v2825_v35 }
 0x22e   :  { %663 = vmatpush1.bf16.msra.mxu1 %v2111_v13 }
 0x22f   :  { %664 = vmatprep.subr.bf16.mxu1 %v2114_v14  ;;  %1720 = vmatpush3.bf16.msra.mxu0 %v2210_v37 }
 0x230   :  { %1721 = vmatprep.subr.bf16.mxu0 %v2825_v35 }
 0x232   :  { %665 = vmatpush1.bf16.msra.mxu1 %v2123_v17 }
 0x233   :  { %666 = vmatprep.subr.bf16.mxu1 %v2126_v18  ;;  %1722 = vmatpush3.bf16.msra.mxu0 %v2217_v38 }
 0x234   :  { %1723 = vmatprep.subr.bf16.mxu0 %v2825_v35 }
 0x236   :  { %667 = vmatpush1.bf16.msra.mxu1 %v2135_v21 }
 0x237   :  { %668 = vmatprep.subr.bf16.mxu1 %v2138_v22  ;;  %1724 = vmatpush3.bf16.msra.mxu0 %v2224_v39 }
 0x238   :  { %1725 = vmatprep.subr.bf16.mxu0 %v2825_v35 }
 0x23a   :  { %669 = vmatpush1.bf16.msra.mxu1 %v2143_v24 }
 0x23b   :  { %670 = vmatprep.subr.bf16.mxu1 %v2151_v27  ;;  %1726 = vmatpush3.bf16.msra.mxu0 %v2231_v40 }
 0x23c   :  { %1727 = vmatprep.subr.bf16.mxu0 %v2825_v35 }
 0x23e   :  { %671 = vmatpush1.bf16.msra.mxu1 %v2157_v29 }
 0x23f   :  { %672 = vmatprep.subr.bf16.mxu1 %v2160_v30  ;;  %1728 = vmatpush3.bf16.msra.mxu0 %v2238_v41 }
 0x240   :  { %1729 = vmatprep.subr.bf16.mxu0 %v2825_v35 }
 0x242   :  { %673 = vmatpush1.bf16.msra.mxu1 %v2169_v32 }
 0x243   :  { %771 = vmatprep.subr.bf16.mxu1 %v2078_v1  ;;  %1730 = vmatpush3.bf16.msra.mxu0 %v2245_v42 }
 0x244   :  { %812 = vmatprep.subr.bf16.mxu0 %v2083_v3 }
 0x245   :  { %691 = vmatmul.mubr.bf16.vlgmr.msra.gmra.mxu1 %v567_v60 }
 0x246   :  { %772 = vmatpush1.bf16.msra.mxu1 %v2080_v2  ;;  %803 = vmatprep.mubr.bf16.mxu1 %v2044_v0 }
 0x247   :  { %773 = vmatprep.subr.bf16.mxu1 %v2088_v5 }
 0x24a   :  { %774 = vmatpush1.bf16.msra.mxu1 %v2090_v6 }
 0x24b   :  { %775 = vmatprep.subr.bf16.mxu1 %v2100_v9 }
 0x24e   :  { %776 = vmatpush1.bf16.msra.mxu1 %v2103_v10 }
 0x24f   :  { %777 = vmatprep.subr.bf16.mxu1 %v2108_v12 }
 0x252   :  { %778 = vmatpush1.bf16.msra.mxu1 %v2117_v15 }
 0x253   :  { %779 = vmatprep.subr.bf16.mxu1 %v2120_v16 }
 0x256   :  { %780 = vmatpush1.bf16.msra.mxu1 %v2129_v19 }
 0x257   :  { %781 = vmatprep.subr.bf16.mxu1 %v2132_v20 }
 0x25a   :  { %782 = vmatpush1.bf16.msra.mxu1 %v2141_v23 }
 0x25b   :  { %783 = vmatprep.subr.bf16.mxu1 %v2146_v25 }
 0x25e   :  { %784 = vmatpush1.bf16.msra.mxu1 %v2149_v26 }
 0x25f   :  { %785 = vmatprep.subr.bf16.mxu1 %v2154_v28 }
 0x262   :  { %786 = vmatpush1.bf16.msra.mxu1 %v2165_v31 }
 0x263   :  { %1735 = vmatprep.subr.bf16.mxu1 %v2825_v35 }
 0x2e5   :  { %v602_v53 = vpop.f32.mrf.mxu1  ;;  %v651_v61 = vpop.f32.mrf.mxu0 }
 0x2e6   :  { %v603_v63 = vadd.f32 %v2315_v57, %v602_v53  ;;  %v699_v49 = vadd.f32 %v651_v61, %v613_v50  ;;  %v616_v53 = vunpack.c.h.bf16 %v1586_v55 }
 0x2e7   :  { %v1713_v33 = vpop.f32.mrf.mxu1  ;;  %v653_v43 = vpop.f32.mrf.mxu0 }
 0x2e8   :  { %1584 = vst [vmem:[%s2822_s4 + $0x8] sm:$0xff] %v603_v63  ;;  %v700_v52 = vadd.f32 %v653_v43, %v614_v48  ;;  %v703_v45 = vmul.f32 0.5, %v699_v49 }
 0x2e9   :  { %v605_v62 = vpop.f32.mrf.mxu1  ;;  %v655_v59 = vpop.f32.mrf.mxu0 }
 0x2ea   :  { %v707_v54 = vmul.f32 0.5, %v700_v52 }
 0x2eb   :  { %v1714_v44 = vpop.f32.mrf.mxu1  ;;  %v656_v47 = vpop.f32.mrf.mxu0 }
 0x2ec   :  { %1918 = vtanh.f32 %v707_v54 }
 0x2ed   :  { %1920 = vtanh.f32 %v703_v45 }
 0x2f9   :  { %v1919_v59 = vpop.eup %1918 }
 0x2fa   :  { %v1921_v43 = vpop.eup %1920  ;;  %v709_v61 = vmul.f32 0.5, %v1919_v59 }
 0x2fb   :  { %v705_v46 = vmul.f32 0.5, %v1921_v43 }
 0x2fc   :  { %v710_v48 = vadd.f32 0.5, %v709_v61 }
 0x2fd   :  { %v706_v50 = vadd.f32 0.5, %v705_v46 }
 0x2fe   :  { %v716_v49 = vmul.f32 %v710_v48, %v2328_v51  ;;  %v1588_v51 = vld [vmem:[%s2818_s0 + $0x30] sm:$0xff] }
 0x305   :  { %v692_v58 = vpop.f32.mrf.mxu1 }
 0x306   :  { %v701_v60 = vadd.f32 %v692_v58, %v615_v56 }
 0x307   :  { %v694_v63 = vpop.f32.mrf.mxu1 }
 0x308   :  { %1922 = vtanh.f32 %v701_v60  ;;  %v702_v62 = vadd.f32 %v694_v63, %v616_v53 }
 0x309   :  { %v696_v33 = vpop.f32.mrf.mxu1 }
 0x30a   :  { %v712_v47 = vmul.f32 0.5, %v702_v62  ;;  %v768_v33 = vunpack.c.h.bf16 %v1588_v51  ;;  %v767_v62 = vunpack.c.l.bf16 %v1588_v51 }
 0x30b   :  { %v697_v44 = vpop.f32.mrf.mxu1 }
 0x30c   :  { %1924 = vtanh.f32 %v712_v47  ;;  %v1589_v47 = vld [vmem:[%s2818_s0 + $0x38] sm:$0xff] }
 0x30d   :  { %v769_v46 = vunpack.c.l.bf16 %v1589_v47 }
 0x315   :  { %v1923_v52 = vpop.eup %1922 }
 0x316   :  { %v717_v54 = vmul.f32 %v1923_v52, %v706_v50  ;;  %v770_v52 = vunpack.c.h.bf16 %v1589_v47 }
 0x318   :  { %v2394_v45 = vadd.f32 %v717_v54, %v716_v49 }
 0x319   :  { %v1925_v55 = vpop.eup %1924 }
 0x31a   :  { %1926 = vtanh.f32 %v2394_v45  ;;  %v714_v56 = vmul.f32 0.5, %v1925_v55 }
 0x31c   :  { %v715_v58 = vadd.f32 0.5, %v714_v56 }
 0x327   :  { %v1927_v60 = vpop.eup %1926 }
 0x328   :  { %v720_v53 = vmul.f32 %v1927_v60, %v715_v58 }
 0x32a   :  { %v721_v63 = vpack.c.bf16 %v720_v53, %v720_v53 }
 0x32c   :  { %1732 = vmatmul.mubr.bf16.vlgmr.msra.gmra.mxu0 %v721_v63  ;;  %804 = vmatmul.mubr.bf16.vlgmr.msra.gmra.mxu1 %v721_v63 }
 0x32d   :  { %813 = vmatpush1.bf16.msra.mxu0 %v2085_v4  ;;  %844 = vmatprep.mubr.bf16.mxu0 %v2044_v0 }
 0x32e   :  { %814 = vmatprep.subr.bf16.mxu0 %v2093_v7  ;;  %1736 = vmatpush3.bf16.msra.mxu1 %v2194_v34 }
 0x32f   :  { %1737 = vmatprep.subr.bf16.mxu1 %v2825_v35  ;;  %1751 = vmatprep.mubr.msk.bf16.mxu1 %vm2047_vm0, %v2825_v35 }
 0x331   :  { %815 = vmatpush1.bf16.msra.mxu0 %v2097_v8 }
 0x332   :  { %816 = vmatprep.subr.bf16.mxu0 %v2105_v11  ;;  %1738 = vmatpush3.bf16.msra.mxu1 %v2203_v36 }
 0x333   :  { %1739 = vmatprep.subr.bf16.mxu1 %v2825_v35 }
 0x335   :  { %817 = vmatpush1.bf16.msra.mxu0 %v2111_v13 }
 0x336   :  { %818 = vmatprep.subr.bf16.mxu0 %v2114_v14  ;;  %1740 = vmatpush3.bf16.msra.mxu1 %v2210_v37 }
 0x337   :  { %1741 = vmatprep.subr.bf16.mxu1 %v2825_v35 }
 0x339   :  { %819 = vmatpush1.bf16.msra.mxu0 %v2123_v17 }
 0x33a   :  { %820 = vmatprep.subr.bf16.mxu0 %v2126_v18  ;;  %1742 = vmatpush3.bf16.msra.mxu1 %v2217_v38 }
 0x33b   :  { %1743 = vmatprep.subr.bf16.mxu1 %v2825_v35 }
 0x33d   :  { %821 = vmatpush1.bf16.msra.mxu0 %v2135_v21 }
 0x33e   :  { %822 = vmatprep.subr.bf16.mxu0 %v2138_v22  ;;  %1744 = vmatpush3.bf16.msra.mxu1 %v2224_v39 }
 0x33f   :  { %1745 = vmatprep.subr.bf16.mxu1 %v2825_v35 }
 0x341   :  { %823 = vmatpush1.bf16.msra.mxu0 %v2143_v24 }
 0x342   :  { %824 = vmatprep.subr.bf16.mxu0 %v2151_v27  ;;  %1746 = vmatpush3.bf16.msra.mxu1 %v2231_v40 }
 0x343   :  { %1747 = vmatprep.subr.bf16.mxu1 %v2825_v35 }
 0x345   :  { %825 = vmatpush1.bf16.msra.mxu0 %v2157_v29 }
 0x346   :  { %826 = vmatprep.subr.bf16.mxu0 %v2160_v30  ;;  %1748 = vmatpush3.bf16.msra.mxu1 %v2238_v41 }
 0x347   :  { %1749 = vmatprep.subr.bf16.mxu1 %v2825_v35 }
 0x349   :  { %827 = vmatpush1.bf16.msra.mxu0 %v2169_v32 }
 0x34a   :  { %925 = vmatprep.subr.bf16.mxu0 %v2078_v1  ;;  %1750 = vmatpush3.bf16.msra.mxu1 %v2245_v42 }
 0x34b   :  { %966 = vmatprep.subr.bf16.mxu1 %v2083_v3 }
 0x34c   :  { %845 = vmatmul.mubr.bf16.vlgmr.msra.gmra.mxu0 %v721_v63 }
 0x34d   :  { %926 = vmatpush1.bf16.msra.mxu0 %v2080_v2  ;;  %957 = vmatprep.mubr.bf16.mxu0 %v2044_v0 }
 0x34e   :  { %927 = vmatprep.subr.bf16.mxu0 %v2088_v5 }
 0x351   :  { %928 = vmatpush1.bf16.msra.mxu0 %v2090_v6 }
 0x352   :  { %929 = vmatprep.subr.bf16.mxu0 %v2100_v9 }
 0x355   :  { %930 = vmatpush1.bf16.msra.mxu0 %v2103_v10 }
 0x356   :  { %931 = vmatprep.subr.bf16.mxu0 %v2108_v12 }
 0x359   :  { %932 = vmatpush1.bf16.msra.mxu0 %v2117_v15 }
 0x35a   :  { %933 = vmatprep.subr.bf16.mxu0 %v2120_v16 }
 0x35d   :  { %934 = vmatpush1.bf16.msra.mxu0 %v2129_v19 }
 0x35e   :  { %935 = vmatprep.subr.bf16.mxu0 %v2132_v20 }
 0x361   :  { %936 = vmatpush1.bf16.msra.mxu0 %v2141_v23 }
 0x362   :  { %937 = vmatprep.subr.bf16.mxu0 %v2146_v25 }
 0x365   :  { %938 = vmatpush1.bf16.msra.mxu0 %v2149_v26 }
 0x366   :  { %939 = vmatprep.subr.bf16.mxu0 %v2154_v28 }
 0x369   :  { %940 = vmatpush1.bf16.msra.mxu0 %v2165_v31 }
 0x36a   :  { %1755 = vmatprep.subr.bf16.mxu0 %v2825_v35 }
 0x3ec   :  { %v756_v1 = vpop.f32.mrf.mxu0  ;;  %v805_v2 = vpop.f32.mrf.mxu1 }
 0x3ed   :  { %v757_v3 = vadd.f32 %v2315_v57, %v756_v1  ;;  %v853_v44 = vadd.f32 %v805_v2, %v767_v62 }
 0x3ee   :  { %v1733_v5 = vpop.f32.mrf.mxu0  ;;  %v807_v6 = vpop.f32.mrf.mxu1 }
 0x3ef   :  { %1587 = vst [vmem:[%s2822_s4 + $0x10] sm:$0xff] %v757_v3  ;;  %v854_v59 = vadd.f32 %v807_v6, %v768_v33  ;;  %v857_v61 = vmul.f32 0.5, %v853_v44 }
 0x3f0   :  { %v759_v9 = vpop.f32.mrf.mxu0  ;;  %v809_v10 = vpop.f32.mrf.mxu1 }
 0x3f1   :  { %v861_v43 = vmul.f32 0.5, %v854_v59 }
 0x3f2   :  { %v1734_v12 = vpop.f32.mrf.mxu0  ;;  %v810_v15 = vpop.f32.mrf.mxu1 }
 0x3f3   :  { %1928 = vtanh.f32 %v861_v43  ;;  %v1592_v43 = vld [vmem:[%s2818_s0 + $0x48] sm:$0xff] }
 0x3f4   :  { %1930 = vtanh.f32 %v857_v61  ;;  %v923_v61 = vunpack.c.l.bf16 %v1592_v43 }
 0x400   :  { %v1929_v56 = vpop.eup %1928 }
 0x401   :  { %v1931_v60 = vpop.eup %1930  ;;  %v863_v53 = vmul.f32 0.5, %v1929_v56 }
 0x402   :  { %v859_v1 = vmul.f32 0.5, %v1931_v60 }
 0x403   :  { %v864_v2 = vadd.f32 0.5, %v863_v53 }
 0x404   :  { %v860_v3 = vadd.f32 0.5, %v859_v1 }
 0x405   :  { %v870_v6 = vmul.f32 %v864_v2, %v2394_v45 }
 0x40c   :  { %v846_v48 = vpop.f32.mrf.mxu0 }
 0x40d   :  { %v855_v50 = vadd.f32 %v846_v48, %v769_v46  ;;  %v924_v48 = vunpack.c.h.bf16 %v1592_v43 }
 0x40e   :  { %v848_v49 = vpop.f32.mrf.mxu0 }
 0x40f   :  { %1932 = vtanh.f32 %v855_v50  ;;  %v856_v55 = vadd.f32 %v848_v49, %v770_v52 }
 0x410   :  { %v850_v54 = vpop.f32.mrf.mxu0 }
 0x411   :  { %v866_v63 = vmul.f32 0.5, %v856_v55 }
 0x412   :  { %v851_v58 = vpop.f32.mrf.mxu0 }
 0x413   :  { %1934 = vtanh.f32 %v866_v63 }
 0x41c   :  { %v1933_v5 = vpop.eup %1932 }
 0x41d   :  { %v871_v9 = vmul.f32 %v1933_v5, %v860_v3 }
 0x41f   :  { %v2460_v10 = vadd.f32 %v871_v9, %v870_v6 }
 0x420   :  { %v1935_v12 = vpop.eup %1934 }
 0x421   :  { %1936 = vtanh.f32 %v2460_v10  ;;  %v868_v15 = vmul.f32 0.5, %v1935_v12 }
 0x423   :  { %v869_v51 = vadd.f32 0.5, %v868_v15 }
 0x42e   :  { %v1937_v33 = vpop.eup %1936 }
 0x42f   :  { %v874_v62 = vmul.f32 %v1937_v33, %v869_v51 }
 0x431   :  { %v875_v59 = vpack.c.bf16 %v874_v62, %v874_v62 }
 0x433   :  { %1752 = vmatmul.mubr.bf16.vlgmr.msra.gmra.mxu1 %v875_v59  ;;  %958 = vmatmul.mubr.bf16.vlgmr.msra.gmra.mxu0 %v875_v59 }
 0x434   :  { %967 = vmatpush1.bf16.msra.mxu1 %v2085_v4  ;;  %998 = vmatprep.mubr.bf16.mxu1 %v2044_v0  ;;  %v2495_v4 = vld [vmem:[#allocation4 + $0xe4] ss:$16 sps:$4 sm:$0xff]  }
 0x435   :  { %968 = vmatprep.subr.bf16.mxu1 %v2093_v7  ;;  %1756 = vmatpush3.bf16.msra.mxu0 %v2194_v34  ;;  %v2499_v7 = vld [vmem:[#allocation4 + $0xec] ss:$16 sps:$4 sm:$0xff]  }
 0x436   :  { %1757 = vmatprep.subr.bf16.mxu0 %v2825_v35  ;;  %1771 = vmatprep.mubr.msk.bf16.mxu0 %vm2047_vm0, %v2825_v35 }
 0x438   :  { %969 = vmatpush1.bf16.msra.mxu1 %v2097_v8  ;;  %v2502_v8 = vld [vmem:[#allocation4 + $0xe0] ss:$16 sps:$4 sm:$0xff]  }
 0x439   :  { %970 = vmatprep.subr.bf16.mxu1 %v2105_v11  ;;  %1758 = vmatpush3.bf16.msra.mxu0 %v2203_v36  ;;  %v2506_v11 = vld [vmem:[#allocation4 + $0xc4] ss:$16 sps:$4 sm:$0xff]  }
 0x43a   :  { %1759 = vmatprep.subr.bf16.mxu0 %v2825_v35 }
 0x43c   :  { %971 = vmatpush1.bf16.msra.mxu1 %v2111_v13  ;;  %v2509_v13 = vld [vmem:[#allocation4 + $0xc0] ss:$16 sps:$4 sm:$0xff]  }
 0x43d   :  { %972 = vmatprep.subr.bf16.mxu1 %v2114_v14  ;;  %1760 = vmatpush3.bf16.msra.mxu0 %v2210_v37  ;;  %v2512_v14 = vld [vmem:[#allocation4 + $0xa4] ss:$16 sps:$4 sm:$0xff]  }
 0x43e   :  { %1761 = vmatprep.subr.bf16.mxu0 %v2825_v35 }
 0x440   :  { %973 = vmatpush1.bf16.msra.mxu1 %v2123_v17  ;;  %v2515_v17 = vld [vmem:[#allocation4 + $0xa0] ss:$16 sps:$4 sm:$0xff]  }
 0x441   :  { %974 = vmatprep.subr.bf16.mxu1 %v2126_v18  ;;  %1762 = vmatpush3.bf16.msra.mxu0 %v2217_v38  ;;  %v2518_v18 = vld [vmem:[#allocation4 + $0x84] ss:$16 sps:$4 sm:$0xff]  }
 0x442   :  { %1763 = vmatprep.subr.bf16.mxu0 %v2825_v35 }
 0x444   :  { %975 = vmatpush1.bf16.msra.mxu1 %v2135_v21  ;;  %v2521_v21 = vld [vmem:[#allocation4 + $0x80] ss:$16 sps:$4 sm:$0xff]  }
 0x445   :  { %976 = vmatprep.subr.bf16.mxu1 %v2138_v22  ;;  %1764 = vmatpush3.bf16.msra.mxu0 %v2224_v39 }
 0x446   :  { %1765 = vmatprep.subr.bf16.mxu0 %v2825_v35 }
 0x448   :  { %977 = vmatpush1.bf16.msra.mxu1 %v2143_v24 }
 0x449   :  { %978 = vmatprep.subr.bf16.mxu1 %v2151_v27  ;;  %1766 = vmatpush3.bf16.msra.mxu0 %v2231_v40 }
 0x44a   :  { %1767 = vmatprep.subr.bf16.mxu0 %v2825_v35 }
 0x44c   :  { %979 = vmatpush1.bf16.msra.mxu1 %v2157_v29 }
 0x44d   :  { %980 = vmatprep.subr.bf16.mxu1 %v2160_v30  ;;  %1768 = vmatpush3.bf16.msra.mxu0 %v2238_v41 }
 0x44e   :  { %1769 = vmatprep.subr.bf16.mxu0 %v2825_v35 }
 0x450   :  { %981 = vmatpush1.bf16.msra.mxu1 %v2169_v32 }
 0x451   :  { %1079 = vmatprep.subr.bf16.mxu1 %v2495_v4  ;;  %1770 = vmatpush3.bf16.msra.mxu0 %v2245_v42 }
 0x452   :  { %1120 = vmatprep.subr.bf16.mxu0 %v2499_v7 }
 0x453   :  { %999 = vmatmul.mubr.bf16.vlgmr.msra.gmra.mxu1 %v875_v59  ;;  %v2547_v59 = vld [vmem:[#allocation4 + $0xe8] ss:$16 sps:$4 sm:$0xff]  }
 0x454   :  { %1080 = vmatpush1.bf16.msra.mxu1 %v2502_v8  ;;  %1111 = vmatprep.mubr.bf16.mxu1 %v2044_v0 }
 0x455   :  { %1081 = vmatprep.subr.bf16.mxu1 %v2506_v11 }
 0x458   :  { %1082 = vmatpush1.bf16.msra.mxu1 %v2509_v13 }
 0x459   :  { %1083 = vmatprep.subr.bf16.mxu1 %v2512_v14 }
 0x45c   :  { %1084 = vmatpush1.bf16.msra.mxu1 %v2515_v17 }
 0x45d   :  { %1085 = vmatprep.subr.bf16.mxu1 %v2518_v18 }
 0x460   :  { %1086 = vmatpush1.bf16.msra.mxu1 %v2521_v21 }
 0x461   :  { %1087 = vmatprep.subr.bf16.mxu1 %v2120_v16 }
 0x464   :  { %1088 = vmatpush1.bf16.msra.mxu1 %v2129_v19 }
 0x465   :  { %1089 = vmatprep.subr.bf16.mxu1 %v2132_v20 }
 0x468   :  { %1090 = vmatpush1.bf16.msra.mxu1 %v2141_v23 }
 0x469   :  { %1091 = vmatprep.subr.bf16.mxu1 %v2146_v25 }
 0x46c   :  { %1092 = vmatpush1.bf16.msra.mxu1 %v2149_v26 }
 0x46d   :  { %1093 = vmatprep.subr.bf16.mxu1 %v2154_v28  ;;  %v1591_v28 = vld [vmem:[%s2818_s0 + $0x40] sm:$0xff] }
 0x46e   :  { %v922_v29 = vunpack.c.h.bf16 %v1591_v28  ;;  %v921_v30 = vunpack.c.l.bf16 %v1591_v28  ;;  %v2632_v28 = vld [vmem:[#allocation4 + $0x24] ss:$16 sps:$4 sm:$0xff]  }
 0x470   :  { %1094 = vmatpush1.bf16.msra.mxu1 %v2165_v31 }
 0x471   :  { %1775 = vmatprep.subr.bf16.mxu1 %v2825_v35 }
 0x4f3   :  { %v910_v22 = vpop.f32.mrf.mxu1  ;;  %v959_v24 = vpop.f32.mrf.mxu0 }
 0x4f4   :  { %v911_v16 = vadd.f32 %v2315_v57, %v910_v22  ;;  %v1007_v32 = vadd.f32 %v959_v24, %v921_v30  ;;  %v2558_v22 = vld [vmem:[#allocation4 + $0xc8] ss:$16 sps:$4 sm:$0xff]   ;;  %v2561_v24 = vld [vmem:[#allocation4 + $0xac] ss:$16 sps:$4 sm:$0xff]   ;;  %v2638_v30 = vld [vmem:[#allocation4 + $0x4] ss:$16 sps:$4 sm:$0xff]  }
 0x4f5   :  { %v1753_v27 = vpop.f32.mrf.mxu1  ;;  %v961_v19 = vpop.f32.mrf.mxu0 }
 0x4f6   :  { %1590 = vst [vmem:[%s2822_s4 + $0x18] sm:$0xff] %v911_v16  ;;  %v1008_v31 = vadd.f32 %v961_v19, %v922_v29  ;;  %v1011_v44 = vmul.f32 0.5, %v1007_v32  ;;  %v2566_v16 = vld [vmem:[#allocation4 + $0xa8] ss:$16 sps:$4 sm:$0xff]   ;;  %v2577_v19 = vld [vmem:[#allocation4 + $0x6c] ss:$16 sps:$4 sm:$0xff]  }
 0x4f7   :  { %v913_v20 = vpop.f32.mrf.mxu1  ;;  %v963_v23 = vpop.f32.mrf.mxu0  ;;  %v2574_v27 = vld [vmem:[#allocation4 + $0x88] ss:$16 sps:$4 sm:$0xff]   ;;  %v2635_v29 = vld [vmem:[#allocation4 + $0x20] ss:$16 sps:$4 sm:$0xff]  }
 0x4f8   :  { %v1015_v45 = vmul.f32 0.5, %v1008_v31  ;;  %v2585_v20 = vld [vmem:[#allocation4 + $0x4c] ss:$16 sps:$4 sm:$0xff]   ;;  %v2641_v31 = vld [vmem:[#allocation4] ss:$16 sps:$4 sm:$0xff]  }
 0x4f9   :  { %v1754_v25 = vpop.f32.mrf.mxu1  ;;  %v964_v26 = vpop.f32.mrf.mxu0  ;;  %v2593_v23 = vld [vmem:[#allocation4 + $0x2c] ss:$16 sps:$4 sm:$0xff]  }
 0x4fa   :  { %1938 = vtanh.f32 %v1015_v45  ;;  %v2601_v25 = vld [vmem:[#allocation4 + $0xc] ss:$16 sps:$4 sm:$0xff]   ;;  %v2629_v26 = vld [vmem:[#allocation4 + $0x40] ss:$16 sps:$4 sm:$0xff]  }
 0x4fb   :  { %1940 = vtanh.f32 %v1011_v44 }
 0x507   :  { %v1939_v54 = vpop.eup %1938 }
 0x508   :  { %v1941_v56 = vpop.eup %1940  ;;  %v1017_v58 = vmul.f32 0.5, %v1939_v54 }
 0x509   :  { %v1013_v53 = vmul.f32 0.5, %v1941_v56 }
 0x50a   :  { %v1018_v63 = vadd.f32 0.5, %v1017_v58 }
 0x50b   :  { %v1014_v1 = vadd.f32 0.5, %v1013_v53 }
 0x50c   :  { %v1024_v3 = vmul.f32 %v1018_v63, %v2460_v10  ;;  %v2551_v10 = vld [vmem:[#allocation4 + $0xcc] ss:$16 sps:$4 sm:$0xff]  }
 0x513   :  { %v1000_v47 = vpop.f32.mrf.mxu1 }
 0x514   :  { %v1009_v46 = vadd.f32 %v1000_v47, %v923_v61 }
 0x515   :  { %v1002_v50 = vpop.f32.mrf.mxu1 }
 0x516   :  { %1942 = vtanh.f32 %v1009_v46  ;;  %v1010_v49 = vadd.f32 %v1002_v50, %v924_v48 }
 0x517   :  { %v1004_v52 = vpop.f32.mrf.mxu1 }
 0x518   :  { %v1020_v60 = vmul.f32 0.5, %v1010_v49  ;;  %v1594_v52 = vld [vmem:[%s2818_s0 + $0x50] sm:$0xff] }
 0x519   :  { %v1005_v55 = vpop.f32.mrf.mxu1  ;;  %v1076_v49 = vunpack.c.h.bf16 %v1594_v52  ;;  %v1075_v54 = vunpack.c.l.bf16 %v1594_v52 }
 0x51a   :  { %1944 = vtanh.f32 %v1020_v60  ;;  %v1595_v60 = vld [vmem:[%s2818_s0 + $0x58] sm:$0xff] }
 0x51b   :  { %v1077_v53 = vunpack.c.l.bf16 %v1595_v60 }
 0x523   :  { %v1943_v2 = vpop.eup %1942 }
 0x524   :  { %v1025_v5 = vmul.f32 %v1943_v2, %v1014_v1  ;;  %v1078_v2 = vunpack.c.h.bf16 %v1595_v60  ;;  %v2703_v60 = vld [vmem:[%s2820_s2 + $0x18] sm:$0xff]  }
 0x526   :  { %v2544_v6 = vadd.f32 %v1025_v5, %v1024_v3 }
 0x527   :  { %v1945_v9 = vpop.eup %1944 }
 0x528   :  { %1946 = vtanh.f32 %v2544_v6  ;;  %v1022_v12 = vmul.f32 0.5, %v1945_v9 }
 0x52a   :  { %v1023_v15 = vadd.f32 0.5, %v1022_v12 }
 0x535   :  { %v1947_v51 = vpop.eup %1946 }
 0x536   :  { %v1028_v33 = vmul.f32 %v1947_v51, %v1023_v15 }
 0x538   :  { %v1029_v62 = vpack.c.bf16 %v1028_v33, %v1028_v33 }
 0x53a   :  { %1772 = vmatmul.mubr.bf16.vlgmr.msra.gmra.mxu0 %v1029_v62  ;;  %1112 = vmatmul.mubr.bf16.vlgmr.msra.gmra.mxu1 %v1029_v62 }
 0x53b   :  { %1121 = vmatpush1.bf16.msra.mxu0 %v2547_v59  ;;  %1152 = vmatprep.mubr.bf16.mxu0 %v2044_v0 }
 0x53c   :  { %1122 = vmatprep.subr.bf16.mxu0 %v2551_v10  ;;  %1776 = vmatpush3.bf16.msra.mxu1 %v2194_v34  ;;  %v2569_v34 = vld [vmem:[#allocation4 + $0x8c] ss:$16 sps:$4 sm:$0xff]  }
 0x53d   :  { %1777 = vmatprep.subr.bf16.mxu1 %v2825_v35  ;;  %1791 = vmatprep.mubr.msk.bf16.mxu1 %vm2047_vm0, %v2825_v35 }
 0x53f   :  { %1123 = vmatpush1.bf16.msra.mxu0 %v2558_v22 }
 0x540   :  { %1124 = vmatprep.subr.bf16.mxu0 %v2561_v24  ;;  %1778 = vmatpush3.bf16.msra.mxu1 %v2203_v36  ;;  %v2582_v36 = vld [vmem:[#allocation4 + $0x68] ss:$16 sps:$4 sm:$0xff]  }
 0x541   :  { %1779 = vmatprep.subr.bf16.mxu1 %v2825_v35 }
 0x543   :  { %1125 = vmatpush1.bf16.msra.mxu0 %v2566_v16 }
 0x544   :  { %1126 = vmatprep.subr.bf16.mxu0 %v2569_v34  ;;  %1780 = vmatpush3.bf16.msra.mxu1 %v2210_v37  ;;  %v2590_v37 = vld [vmem:[#allocation4 + $0x48] ss:$16 sps:$4 sm:$0xff]  }
 0x545   :  { %1781 = vmatprep.subr.bf16.mxu1 %v2825_v35 }
 0x547   :  { %1127 = vmatpush1.bf16.msra.mxu0 %v2574_v27 }
 0x548   :  { %1128 = vmatprep.subr.bf16.mxu0 %v2577_v19  ;;  %1782 = vmatpush3.bf16.msra.mxu1 %v2217_v38  ;;  %v2598_v38 = vld [vmem:[#allocation4 + $0x28] ss:$16 sps:$4 sm:$0xff]  }
 0x549   :  { %1783 = vmatprep.subr.bf16.mxu1 %v2825_v35 }
 0x54b   :  { %1129 = vmatpush1.bf16.msra.mxu0 %v2582_v36 }
 0x54c   :  { %1130 = vmatprep.subr.bf16.mxu0 %v2585_v20  ;;  %1784 = vmatpush3.bf16.msra.mxu1 %v2224_v39  ;;  %v2606_v39 = vld [vmem:[#allocation4 + $0x8] ss:$16 sps:$4 sm:$0xff]  }
 0x54d   :  { %1785 = vmatprep.subr.bf16.mxu1 %v2825_v35 }
 0x54f   :  { %1131 = vmatpush1.bf16.msra.mxu0 %v2590_v37 }
 0x550   :  { %1132 = vmatprep.subr.bf16.mxu0 %v2593_v23  ;;  %1786 = vmatpush3.bf16.msra.mxu1 %v2231_v40  ;;  %v2620_v40 = vld [vmem:[#allocation4 + $0x64] ss:$16 sps:$4 sm:$0xff]  }
 0x551   :  { %1787 = vmatprep.subr.bf16.mxu1 %v2825_v35 }
 0x553   :  { %1133 = vmatpush1.bf16.msra.mxu0 %v2598_v38 }
 0x554   :  { %1134 = vmatprep.subr.bf16.mxu0 %v2601_v25  ;;  %1788 = vmatpush3.bf16.msra.mxu1 %v2238_v41  ;;  %v2623_v41 = vld [vmem:[#allocation4 + $0x60] ss:$16 sps:$4 sm:$0xff]  }
 0x555   :  { %1789 = vmatprep.subr.bf16.mxu1 %v2825_v35 }
 0x557   :  { %1135 = vmatpush1.bf16.msra.mxu0 %v2606_v39 }
 0x558   :  { %1233 = vmatprep.subr.bf16.mxu0 %v2495_v4  ;;  %1790 = vmatpush3.bf16.msra.mxu1 %v2245_v42  ;;  %v2626_v42 = vld [vmem:[#allocation4 + $0x44] ss:$16 sps:$4 sm:$0xff]  }
 0x559   :  { %1274 = vmatprep.subr.bf16.mxu1 %v2499_v7 }
 0x55a   :  { %1153 = vmatmul.mubr.bf16.vlgmr.msra.gmra.mxu0 %v1029_v62 }
 0x55b   :  { %1234 = vmatpush1.bf16.msra.mxu0 %v2502_v8  ;;  %1265 = vmatprep.mubr.bf16.mxu0 %v2044_v0 }
 0x55c   :  { %1235 = vmatprep.subr.bf16.mxu0 %v2506_v11 }
 0x55f   :  { %1236 = vmatpush1.bf16.msra.mxu0 %v2509_v13 }
 0x560   :  { %1237 = vmatprep.subr.bf16.mxu0 %v2512_v14 }
 0x563   :  { %1238 = vmatpush1.bf16.msra.mxu0 %v2515_v17 }
 0x564   :  { %1239 = vmatprep.subr.bf16.mxu0 %v2518_v18 }
 0x567   :  { %1240 = vmatpush1.bf16.msra.mxu0 %v2521_v21 }
 0x568   :  { %1241 = vmatprep.subr.bf16.mxu0 %v2620_v40 }
 0x56b   :  { %1242 = vmatpush1.bf16.msra.mxu0 %v2623_v41 }
 0x56c   :  { %1243 = vmatprep.subr.bf16.mxu0 %v2626_v42 }
 0x56f   :  { %1244 = vmatpush1.bf16.msra.mxu0 %v2629_v26 }
 0x570   :  { %1245 = vmatprep.subr.bf16.mxu0 %v2632_v28 }
 0x573   :  { %1246 = vmatpush1.bf16.msra.mxu0 %v2635_v29 }
 0x574   :  { %1247 = vmatprep.subr.bf16.mxu0 %v2638_v30 }
 0x577   :  { %1248 = vmatpush1.bf16.msra.mxu0 %v2641_v31 }
 0x578   :  { %1795 = vmatprep.subr.bf16.mxu0 %v2825_v35 }
 0x5fa   :  { %v1064_v32 = vpop.f32.mrf.mxu0  ;;  %v1113_v45 = vpop.f32.mrf.mxu1 }
 0x5fb   :  { %v1065_v44 = vadd.f32 %v2315_v57, %v1064_v32  ;;  %v1161_v56 = vadd.f32 %v1113_v45, %v1075_v54 }
 0x5fc   :  { %v1773_v43 = vpop.f32.mrf.mxu0  ;;  %v1115_v61 = vpop.f32.mrf.mxu1 }
 0x5fd   :  { %1593 = vst [vmem:[%s2822_s4 + $0x20] sm:$0xff] %v1065_v44  ;;  %v1162_v55 = vadd.f32 %v1115_v61, %v1076_v49  ;;  %v1165_v57 = vmul.f32 0.5, %v1161_v56  ;;  %v2676_v56 = vld [vmem:[%s2820_s2 + $0x30] sm:$0xff]  }
 0x5fe   :  { %v1067_v47 = vpop.f32.mrf.mxu0  ;;  %v1117_v46 = vpop.f32.mrf.mxu1 }
 0x5ff   :  { %v1169_v58 = vmul.f32 0.5, %v1162_v55 }
 0x600   :  { %v1774_v48 = vpop.f32.mrf.mxu0  ;;  %v1118_v50 = vpop.f32.mrf.mxu1 }
 0x601   :  { %1948 = vtanh.f32 %v1169_v58  ;;  %v2685_v58 = vld [vmem:[%s2820_s2 + $0x28] sm:$0xff]  }
 0x602   :  { %1950 = vtanh.f32 %v1165_v57  ;;  %v2694_v57 = vld [vmem:[%s2820_s2 + $0x20] sm:$0xff]  }
 0x60e   :  { %v1949_v12 = vpop.eup %1948 }
 0x60f   :  { %v1951_v51 = vpop.eup %1950  ;;  %v1171_v33 = vmul.f32 0.5, %v1949_v12 }
 0x610   :  { %v1167_v32 = vmul.f32 0.5, %v1951_v51 }
 0x611   :  { %v1172_v45 = vadd.f32 0.5, %v1171_v33 }
 0x612   :  { %v1168_v44 = vadd.f32 0.5, %v1167_v32 }
 0x613   :  { %v1178_v61 = vmul.f32 %v1172_v45, %v2544_v6  ;;  %v2665_v6 = vld [vmem:[%s2820_s2 + $0x38] sm:$0xff]  }
 0x61a   :  { %v1154_v63 = vpop.f32.mrf.mxu0 }
 0x61b   :  { %v1163_v1 = vadd.f32 %v1154_v63, %v1077_v53  ;;  %v2712_v53 = vld [vmem:[%s2820_s2 + $0x10] sm:$0xff]   ;;  %v2721_v63 = vld [vmem:[%s2820_s2 + $0x8] sm:$0xff]  }
 0x61c   :  { %v1156_v3 = vpop.f32.mrf.mxu0 }
 0x61d   :  { %1952 = vtanh.f32 %v1163_v1  ;;  %v1164_v9 = vadd.f32 %v1156_v3, %v1078_v2  ;;  %v2730_v1 = vld [vmem:[%s2820_s2] sm:$0xff]   ;;  %v1598_v2 = vld [vmem:[%s2818_s0 + $0x68] sm:$0xff] }
 0x61e   :  { %v1158_v5 = vpop.f32.mrf.mxu0  ;;  %v1231_v3 = vunpack.c.l.bf16 %v1598_v2  ;;  %v1232_v12 = vunpack.c.h.bf16 %v1598_v2 }
 0x61f   :  { %v1174_v62 = vmul.f32 0.5, %v1164_v9 }
 0x620   :  { %v1159_v15 = vpop.f32.mrf.mxu0 }
 0x621   :  { %1954 = vtanh.f32 %v1174_v62 }
 0x62a   :  { %v1953_v43 = vpop.eup %1952 }
 0x62b   :  { %v1179_v47 = vmul.f32 %v1953_v43, %v1168_v44 }
 0x62d   :  { %v2656_v46 = vadd.f32 %v1179_v47, %v1178_v61 }
 0x62e   :  { %v1955_v48 = vpop.eup %1954 }
 0x62f   :  { %1956 = vtanh.f32 %v2656_v46  ;;  %v1176_v50 = vmul.f32 0.5, %v1955_v48 }
 0x631   :  { %v1177_v52 = vadd.f32 0.5, %v1176_v50 }
 0x63c   :  { %v1957_v49 = vpop.eup %1956 }
 0x63d   :  { %v1182_v54 = vmul.f32 %v1957_v49, %v1177_v52 }
 0x63f   :  { %v1183_v55 = vpack.c.bf16 %v1182_v54, %v1182_v54 }
 0x641   :  { %1792 = vmatmul.mubr.bf16.vlgmr.msra.gmra.mxu1 %v1183_v55  ;;  %1266 = vmatmul.mubr.bf16.vlgmr.msra.gmra.mxu0 %v1183_v55 }
 0x642   :  { %1275 = vmatpush1.bf16.msra.mxu1 %v2547_v59  ;;  %1306 = vmatprep.mubr.bf16.mxu1 %v2044_v0 }
 0x643   :  { %1276 = vmatprep.subr.bf16.mxu1 %v2551_v10  ;;  %1796 = vmatpush3.bf16.msra.mxu0 %v2665_v6 }
 0x644   :  { %1797 = vmatprep.subr.bf16.mxu0 %v2825_v35  ;;  %1811 = vmatprep.mubr.msk.bf16.mxu0 %vm2047_vm0, %v2825_v35 }
 0x646   :  { %1277 = vmatpush1.bf16.msra.mxu1 %v2558_v22 }
 0x647   :  { %1278 = vmatprep.subr.bf16.mxu1 %v2561_v24  ;;  %1798 = vmatpush3.bf16.msra.mxu0 %v2676_v56 }
 0x648   :  { %1799 = vmatprep.subr.bf16.mxu0 %v2825_v35 }
 0x64a   :  { %1279 = vmatpush1.bf16.msra.mxu1 %v2566_v16 }
 0x64b   :  { %1280 = vmatprep.subr.bf16.mxu1 %v2569_v34  ;;  %1800 = vmatpush3.bf16.msra.mxu0 %v2685_v58 }
 0x64c   :  { %1801 = vmatprep.subr.bf16.mxu0 %v2825_v35 }
 0x64e   :  { %1281 = vmatpush1.bf16.msra.mxu1 %v2574_v27 }
 0x64f   :  { %1282 = vmatprep.subr.bf16.mxu1 %v2577_v19  ;;  %1802 = vmatpush3.bf16.msra.mxu0 %v2694_v57 }
 0x650   :  { %1803 = vmatprep.subr.bf16.mxu0 %v2825_v35 }
 0x652   :  { %1283 = vmatpush1.bf16.msra.mxu1 %v2582_v36 }
 0x653   :  { %1284 = vmatprep.subr.bf16.mxu1 %v2585_v20  ;;  %1804 = vmatpush3.bf16.msra.mxu0 %v2703_v60 }
 0x654   :  { %1805 = vmatprep.subr.bf16.mxu0 %v2825_v35 }
 0x656   :  { %1285 = vmatpush1.bf16.msra.mxu1 %v2590_v37 }
 0x657   :  { %1286 = vmatprep.subr.bf16.mxu1 %v2593_v23  ;;  %1806 = vmatpush3.bf16.msra.mxu0 %v2712_v53 }
 0x658   :  { %1807 = vmatprep.subr.bf16.mxu0 %v2825_v35 }
 0x65a   :  { %1287 = vmatpush1.bf16.msra.mxu1 %v2598_v38 }
 0x65b   :  { %1288 = vmatprep.subr.bf16.mxu1 %v2601_v25  ;;  %1808 = vmatpush3.bf16.msra.mxu0 %v2721_v63 }
 0x65c   :  { %1809 = vmatprep.subr.bf16.mxu0 %v2825_v35 }
 0x65e   :  { %1289 = vmatpush1.bf16.msra.mxu1 %v2606_v39 }
 0x65f   :  { %1387 = vmatprep.subr.bf16.mxu1 %v2495_v4  ;;  %1810 = vmatpush3.bf16.msra.mxu0 %v2730_v1 }
 0x660   :  { %1428 = vmatprep.subr.bf16.mxu0 %v2499_v7 }
 0x661   :  { %1307 = vmatmul.mubr.bf16.vlgmr.msra.gmra.mxu1 %v1183_v55 }
 0x662   :  { %1388 = vmatpush1.bf16.msra.mxu1 %v2502_v8  ;;  %1419 = vmatprep.mubr.bf16.mxu1 %v2044_v0  ;;  %v2754_v8 = vld [vmem:[%s2821_s3] ss:$0 sm:$0xff] }
 0x663   :  { %1389 = vmatprep.subr.bf16.mxu1 %v2506_v11 }
 0x666   :  { %1390 = vmatpush1.bf16.msra.mxu1 %v2509_v13 }
 0x667   :  { %1391 = vmatprep.subr.bf16.mxu1 %v2512_v14 }
 0x66a   :  { %1392 = vmatpush1.bf16.msra.mxu1 %v2515_v17 }
 0x66b   :  { %1393 = vmatprep.subr.bf16.mxu1 %v2518_v18 }
 0x66e   :  { %1394 = vmatpush1.bf16.msra.mxu1 %v2521_v21 }
 0x66f   :  { %1395 = vmatprep.subr.bf16.mxu1 %v2620_v40 }
 0x672   :  { %1396 = vmatpush1.bf16.msra.mxu1 %v2623_v41  ;;  %v1597_v41 = vld [vmem:[%s2818_s0 + $0x60] sm:$0xff] }
 0x673   :  { %1397 = vmatprep.subr.bf16.mxu1 %v2626_v42  ;;  %v1230_v42 = vunpack.c.h.bf16 %v1597_v41 }
 0x676   :  { %1398 = vmatpush1.bf16.msra.mxu1 %v2629_v26  ;;  %v1229_v26 = vunpack.c.l.bf16 %v1597_v41 }
 0x677   :  { %1399 = vmatprep.subr.bf16.mxu1 %v2632_v28 }
 0x67a   :  { %1400 = vmatpush1.bf16.msra.mxu1 %v2635_v29 }
 0x67b   :  { %1401 = vmatprep.subr.bf16.mxu1 %v2638_v30 }
 0x67e   :  { %1402 = vmatpush1.bf16.msra.mxu1 %v2641_v31 }
 0x67f   :  { %1815 = vmatprep.subr.bf16.mxu1 %v2825_v35 }
 0x701   :  { %v1218_v4 = vpop.f32.mrf.mxu1  ;;  %v1267_v7 = vpop.f32.mrf.mxu0 }
 0x702   :  { %v1219_v11 = vadd.f32 %v2754_v8, %v1218_v4  ;;  %v1315_v29 = vadd.f32 %v1267_v7, %v1229_v26 }
 0x703   :  { %v1793_v13 = vpop.f32.mrf.mxu1  ;;  %v1269_v14 = vpop.f32.mrf.mxu0 }
 0x704   :  { %1596 = vst [vmem:[%s2822_s4 + $0x28] sm:$0xff] %v1219_v11  ;;  %v1316_v28 = vadd.f32 %v1269_v14, %v1230_v42  ;;  %v1319_v31 = vmul.f32 0.5, %v1315_v29 }
 0x705   :  { %v1221_v17 = vpop.f32.mrf.mxu1  ;;  %v1271_v18 = vpop.f32.mrf.mxu0 }
 0x706   :  { %v1323_v30 = vmul.f32 0.5, %v1316_v28 }
 0x707   :  { %v1794_v21 = vpop.f32.mrf.mxu1  ;;  %v1272_v40 = vpop.f32.mrf.mxu0 }
 0x708   :  { %1958 = vtanh.f32 %v1323_v30 }
 0x709   :  { %1960 = vtanh.f32 %v1319_v31 }
 0x715   :  { %v1959_v62 = vpop.eup %1958 }
 0x716   :  { %v1961_v45 = vpop.eup %1960  ;;  %v1325_v44 = vmul.f32 0.5, %v1959_v62 }
 0x717   :  { %v1321_v61 = vmul.f32 0.5, %v1961_v45 }
 0x718   :  { %v1326_v47 = vadd.f32 0.5, %v1325_v44 }
 0x719   :  { %v1322_v48 = vadd.f32 0.5, %v1321_v61 }
 0x71a   :  { %v1332_v52 = vmul.f32 %v1326_v47, %v2656_v46 }
 0x721   :  { %v1308_v5 = vpop.f32.mrf.mxu1 }
 0x722   :  { %v1317_v9 = vadd.f32 %v1308_v5, %v1231_v3 }
 0x723   :  { %v1310_v15 = vpop.f32.mrf.mxu1 }
 0x724   :  { %1962 = vtanh.f32 %v1317_v9  ;;  %v1318_v33 = vadd.f32 %v1310_v15, %v1232_v12 }
 0x725   :  { %v1312_v51 = vpop.f32.mrf.mxu1 }
 0x726   :  { %v1328_v43 = vmul.f32 0.5, %v1318_v33 }
 0x727   :  { %v1313_v32 = vpop.f32.mrf.mxu1 }
 0x728   :  { %1964 = vtanh.f32 %v1328_v43 }
 0x731   :  { %v1963_v50 = vpop.eup %1962 }
 0x732   :  { %v1333_v49 = vmul.f32 %v1963_v50, %v1322_v48 }
 0x734   :  { %v2767_v54 = vadd.f32 %v1333_v49, %v1332_v52 }
 0x735   :  { %v1965_v55 = vpop.eup %1964 }
 0x736   :  { %1966 = vtanh.f32 %v2767_v54  ;;  %v1330_v4 = vmul.f32 0.5, %v1965_v55 }
 0x738   :  { %v1331_v7 = vadd.f32 0.5, %v1330_v4 }
 0x743   :  { %v1967_v11 = vpop.eup %1966 }
 0x744   :  { %v1336_v13 = vmul.f32 %v1967_v11, %v1331_v7 }
 0x746   :  { %v1337_v14 = vpack.c.bf16 %v1336_v13, %v1336_v13 }
 0x748   :  { %1812 = vmatmul.mubr.bf16.vlgmr.msra.gmra.mxu0 %v1337_v14  ;;  %1420 = vmatmul.mubr.bf16.vlgmr.msra.gmra.mxu1 %v1337_v14 }
 0x749   :  { %1429 = vmatpush1.bf16.msra.mxu0 %v2547_v59  ;;  %1460 = vmatprep.mubr.bf16.mxu0 %v2044_v0 }
 0x74a   :  { %1430 = vmatprep.subr.bf16.mxu0 %v2551_v10  ;;  %1816 = vmatpush3.bf16.msra.mxu1 %v2665_v6 }
 0x74b   :  { %1817 = vmatprep.subr.bf16.mxu1 %v2825_v35  ;;  %1831 = vmatprep.mubr.msk.bf16.mxu1 %vm2047_vm0, %v2825_v35 }
 0x74d   :  { %1431 = vmatpush1.bf16.msra.mxu0 %v2558_v22 }
 0x74e   :  { %1432 = vmatprep.subr.bf16.mxu0 %v2561_v24  ;;  %1818 = vmatpush3.bf16.msra.mxu1 %v2676_v56 }
 0x74f   :  { %1819 = vmatprep.subr.bf16.mxu1 %v2825_v35 }
 0x751   :  { %1433 = vmatpush1.bf16.msra.mxu0 %v2566_v16 }
 0x752   :  { %1434 = vmatprep.subr.bf16.mxu0 %v2569_v34  ;;  %1820 = vmatpush3.bf16.msra.mxu1 %v2685_v58 }
 0x753   :  { %1821 = vmatprep.subr.bf16.mxu1 %v2825_v35 }
 0x755   :  { %1435 = vmatpush1.bf16.msra.mxu0 %v2574_v27 }
 0x756   :  { %1436 = vmatprep.subr.bf16.mxu0 %v2577_v19  ;;  %1822 = vmatpush3.bf16.msra.mxu1 %v2694_v57 }
 0x757   :  { %1823 = vmatprep.subr.bf16.mxu1 %v2825_v35 }
 0x759   :  { %1437 = vmatpush1.bf16.msra.mxu0 %v2582_v36 }
 0x75a   :  { %1438 = vmatprep.subr.bf16.mxu0 %v2585_v20  ;;  %1824 = vmatpush3.bf16.msra.mxu1 %v2703_v60 }
 0x75b   :  { %1825 = vmatprep.subr.bf16.mxu1 %v2825_v35 }
 0x75d   :  { %1439 = vmatpush1.bf16.msra.mxu0 %v2590_v37 }
 0x75e   :  { %1440 = vmatprep.subr.bf16.mxu0 %v2593_v23  ;;  %1826 = vmatpush3.bf16.msra.mxu1 %v2712_v53 }
 0x75f   :  { %1827 = vmatprep.subr.bf16.mxu1 %v2825_v35 }
 0x761   :  { %1441 = vmatpush1.bf16.msra.mxu0 %v2598_v38 }
 0x762   :  { %1442 = vmatprep.subr.bf16.mxu0 %v2601_v25  ;;  %1828 = vmatpush3.bf16.msra.mxu1 %v2721_v63 }
 0x763   :  { %1829 = vmatprep.subr.bf16.mxu1 %v2825_v35  ;;  %v1600_v35 = vld [vmem:[%s2818_s0 + $0x70] sm:$0xff] }
 0x764   :  { %v1384_v36 = vunpack.c.h.bf16 %v1600_v35  ;;  %v1383_v20 = vunpack.c.l.bf16 %v1600_v35 }
 0x765   :  { %1443 = vmatpush1.bf16.msra.mxu0 %v2606_v39  ;;  %v1601_v39 = vld [vmem:[%s2818_s0 + $0x78] sm:$0xff] }
 0x766   :  { %1830 = vmatpush3.bf16.msra.mxu1 %v2730_v1  ;;  %v1385_v46 = vunpack.c.l.bf16 %v1601_v39  ;;  %v1386_v58 = vunpack.c.h.bf16 %v1601_v39 }
 0x768   :  { %1461 = vmatmul.mubr.bf16.vlgmr.msra.gmra.mxu0 %v1337_v14 }
 0x808   :  { %v1372_v0 = vpop.f32.mrf.mxu0  ;;  %v1421_v59 = vpop.f32.mrf.mxu1 }
 0x809   :  { %v1373_v10 = vadd.f32 %v2754_v8, %v1372_v0  ;;  %v1469_v23 = vadd.f32 %v1421_v59, %v1383_v20 }
 0x80a   :  { %v1813_v22 = vpop.f32.mrf.mxu0  ;;  %v1423_v24 = vpop.f32.mrf.mxu1 }
 0x80b   :  { %1599 = vst [vmem:[%s2822_s4 + $0x30] sm:$0xff] %v1373_v10  ;;  %v1470_v37 = vadd.f32 %v1423_v24, %v1384_v36  ;;  %v1473_v25 = vmul.f32 0.5, %v1469_v23 }
 0x80c   :  { %v1375_v16 = vpop.f32.mrf.mxu0  ;;  %v1425_v34 = vpop.f32.mrf.mxu1 }
 0x80d   :  { %v1477_v38 = vmul.f32 0.5, %v1470_v37 }
 0x80e   :  { %v1814_v27 = vpop.f32.mrf.mxu0  ;;  %v1426_v19 = vpop.f32.mrf.mxu1 }
 0x80f   :  { %1968 = vtanh.f32 %v1477_v38 }
 0x810   :  { %1970 = vtanh.f32 %v1473_v25 }
 0x81c   :  { %v1969_v63 = vpop.eup %1968 }
 0x81d   :  { %v1971_v17 = vpop.eup %1970  ;;  %v1479_v18 = vmul.f32 0.5, %v1969_v63 }
 0x81e   :  { %v1475_v40 = vmul.f32 0.5, %v1971_v17 }
 0x81f   :  { %v1480_v41 = vadd.f32 0.5, %v1479_v18 }
 0x820   :  { %v1476_v42 = vadd.f32 0.5, %v1475_v40 }
 0x821   :  { %v1486_v28 = vmul.f32 %v1480_v41, %v2767_v54 }
 0x828   :  { %v1462_v6 = vpop.f32.mrf.mxu0 }
 0x829   :  { %v1471_v56 = vadd.f32 %v1462_v6, %v1385_v46 }
 0x82a   :  { %v1464_v57 = vpop.f32.mrf.mxu0 }
 0x82b   :  { %1972 = vtanh.f32 %v1471_v56  ;;  %v1472_v53 = vadd.f32 %v1464_v57, %v1386_v58 }
 0x82c   :  { %v1466_v60 = vpop.f32.mrf.mxu0 }
 0x82d   :  { %v1482_v21 = vmul.f32 0.5, %v1472_v53 }
 0x82e   :  { %v1467_v1 = vpop.f32.mrf.mxu0 }
 0x82f   :  { %1974 = vtanh.f32 %v1482_v21 }
 0x838   :  { %v1973_v26 = vpop.eup %1972 }
 0x839   :  { %v1487_v29 = vmul.f32 %v1973_v26, %v1476_v42 }
 0x83b   :  { %v1488_v30 = vadd.f32 %v1487_v29, %v1486_v28 }
 0x83c   :  { %v1975_v31 = vpop.eup %1974 }
 0x83d   :  { %1976 = vtanh.f32 %v1488_v30  ;;  %v1484_v2 = vmul.f32 0.5, %v1975_v31 }
 0x83f   :  { %v1485_v3 = vadd.f32 0.5, %v1484_v2 }
 0x84a   :  { %v1977_v5 = vpop.eup %1976 }
 0x84b   :  { %v1490_v9 = vmul.f32 %v1977_v5, %v1485_v3 }
 0x84d   :  { %v1491_v12 = vpack.c.bf16 %v1490_v9, %v1490_v9 }
 0x84f   :  { %1832 = vmatmul.mubr.bf16.vlgmr.msra.gmra.mxu1 %v1491_v12 }
 0x90f   :  { %v1526_v15 = vpop.f32.mrf.mxu1 }
 0x910   :  { %v1527_v51 = vadd.f32 %v2754_v8, %v1526_v15 }
 0x911   :  { %v1833_v33 = vpop.f32.mrf.mxu1 }
 0x912   :  { %1602 = vst [vmem:[%s2822_s4 + $0x38] sm:$0xff] %v1527_v51 }
 0x913   :  { %v1529_v62 = vpop.f32.mrf.mxu1 }
 0x915   :  { %v1834_v32 = vpop.f32.mrf.mxu1 }
 0x916   :  { %1540 = vsyncpa [#allocation5], 1 }

</bundles_post_ra>
